<compile_context>
chip_gen: v7x
topology: tpu7x:2x2x1
jax: 0.10.0
libtpu: 0.0.40
codegen_flags: <defaults>
</compile_context>

<pallas_src>
import math
import functools

import jax
import jax.numpy as jnp
from jax.experimental import pallas as pl
from jax.experimental.pallas import tpu as pltpu

EPS = 1e-5  # nn.LayerNorm default


# -----------------------------------------------------------------------------
# Kernel 1: LayerNorm1 + gated sparse multi-head attention + residual.
# grid = (B, num_head_groups); the head-group axis is sequential ("arbitrary")
# and accumulates the attention output projection into a VMEM f32 scratch.
# -----------------------------------------------------------------------------
def attention_kernel(
    x_ref, pos_bias_ref,
    g1_ref, be1_ref,                       # LayerNorm1 gamma/beta
    wq_ref, bq_ref, wk_ref, bk_ref, wv_ref, bv_ref,   # group-major projections
    wo_ref, bo_ref,                        # per-group out-proj rows, shared bias
    x1_ref,
    xn_s, acc_s,                           # VMEM scratch: LN1(x) bf16, f32 accumulator
    *, heads_per_group, head_dim, window_size, tau,
):
    hg = pl.program_id(1)
    G, Dh = heads_per_group, head_dim
    L = x_ref.shape[1]

    # ---- once per batch block: LayerNorm1 (f32) + accumulator init ----------
    @pl.when(hg == 0)
    def _init():
        x = x_ref[0]                                            # (L, D) f32
        mu = jnp.mean(x, axis=-1, keepdims=True)
        var = jnp.mean((x - mu) ** 2, axis=-1, keepdims=True)
        xn = (x - mu) * jax.lax.rsqrt(var + EPS) * g1_ref[...] + be1_ref[...]
        xn_s[...] = xn.astype(jnp.bfloat16)
        acc_s[...] = jnp.zeros_like(acc_s)

    xn = xn_s[...]                                              # (L, D) bf16

    # ---- group-width projections (MXU fill N = G*Dh), f32 accumulation ------
    # 1/sqrt(Dh) is already folded into wq/bq in the wrapper.
    q = jnp.dot(xn, wq_ref[0], preferred_element_type=jnp.float32) + bq_ref[0]
    k = jnp.dot(xn, wk_ref[0], preferred_element_type=jnp.float32) + bk_ref[0]
    v = jnp.dot(xn, wv_ref[0], preferred_element_type=jnp.float32) + bv_ref[0]

    # ---- banded + global "allowed" mask, regenerated on the VPU -------------
    row = jax.lax.broadcasted_iota(jnp.int32, (L, L), 0)
    col = jax.lax.broadcasted_iota(jnp.int32, (L, L), 1)
    allowed = (jnp.abs(row - col) <= window_size) | (row == 0) | (col == 0)
    pos_bias = pos_bias_ref[...].astype(jnp.float32)
    neg = jnp.finfo(jnp.float32).min

    # ---- per-head gated attention inside the group (static unroll) ----------
    pv_parts = []
    for g in range(G):
        sl = slice(g * Dh, (g + 1) * Dh)
        qh = q[:, sl].astype(jnp.bfloat16)
        kh = k[:, sl].astype(jnp.bfloat16)
        vh = v[:, sl].astype(jnp.bfloat16)
        s = jax.lax.dot_general(qh, kh, (((1,), (1,)), ((), ())),
                                preferred_element_type=jnp.float32)   # (L, L)
        s = jnp.where(allowed & (s > tau), s, neg) + pos_bias
        s = s - jnp.max(s, axis=-1, keepdims=True)
        p = jnp.exp(s)
        attn = p * pl.reciprocal(jnp.sum(p, axis=-1, keepdims=True), approx=True)
        pv_parts.append(jnp.dot(attn.astype(jnp.bfloat16), vh,
                                preferred_element_type=jnp.float32))  # (L, Dh)
    pv = jnp.concatenate(pv_parts, axis=-1) if G > 1 else pv_parts[0]  # (L, G*Dh)

    # ---- fused output projection for the whole group (K = G*Dh) -------------
    acc_s[...] += jnp.dot(pv.astype(jnp.bfloat16), wo_ref[0],
                          preferred_element_type=jnp.float32)

    # ---- once per batch block: residual 1 ------------------------------------
    @pl.when(hg == pl.num_programs(1) - 1)
    def _finalize():
        x1_ref[0] = (x_ref[0] + acc_s[...] + bo_ref[...]).astype(x1_ref.dtype)


# -----------------------------------------------------------------------------
# Kernel 2: LayerNorm2 + FFN (streamed over F-tiles) + residual.
# grid = (B, num_f_tiles).
# -----------------------------------------------------------------------------
def ffn_kernel(
    x1_ref, g2_ref, be2_ref,
    wf1_ref, bf1_ref, wf2_ref, bf2_ref,
    o_ref,
    xn2_s, acc_s,
):
    f = pl.program_id(1)

    @pl.when(f == 0)
    def _init():
        x1 = x1_ref[0]
        mu = jnp.mean(x1, axis=-1, keepdims=True)
        var = jnp.mean((x1 - mu) ** 2, axis=-1, keepdims=True)
        xn2 = (x1 - mu) * jax.lax.rsqrt(var + EPS) * g2_ref[...] + be2_ref[...]
        xn2_s[...] = xn2.astype(jnp.bfloat16)
        acc_s[...] = jnp.zeros_like(acc_s)

    h = jnp.dot(xn2_s[...], wf1_ref[...], preferred_element_type=jnp.float32) + bf1_ref[...]
    h = jnp.maximum(h, 0.0)
    acc_s[...] += jnp.dot(h.astype(jnp.bfloat16), wf2_ref[...],
                          preferred_element_type=jnp.float32)

    @pl.when(f == pl.num_programs(1) - 1)
    def _finalize():
        o_ref[0] = (x1_ref[0] + acc_s[...] + bf2_ref[...]).astype(o_ref.dtype)


# -----------------------------------------------------------------------------
# Wrapper
# -----------------------------------------------------------------------------
def _largest_divisor_at_most(n, cap):
    cap = max(1, min(n, cap))
    while n % cap:
        cap -= 1
    return cap


def _vmem_limit_bytes():
    try:
        cap = getattr(pltpu.get_tpu_info(), "vmem_capacity_bytes", None)
        if cap:
            return int(cap * 0.85)       # leave headroom below physical VMEM
    except Exception:
        pass
    return 48 * 1024 * 1024              # conservative fallback (safe on v7x)


def transformer_encoder_block(x, pos_bias, params, *, num_heads, window_size, tau):
    B, L, D = x.shape
    H = num_heads
    assert D % H == 0, "embed_dim must be divisible by num_heads"
    Dh = D // H
    F = params["wf1"].shape[1]
    inv_scale = 1.0 / math.sqrt(Dh)
    bf16 = jnp.bfloat16

    # Head-group size: aim for ~256 lanes of MXU fill per group, G must divide H.
    G = _largest_divisor_at_most(H, max(1, 256 // max(Dh, 1)))
    NG = H // G
    # FFN hidden tile (streams wf1/wf2; avoids keeping them resident).
    TF = _largest_divisor_at_most(F, 512)
    NF = F // TF

    # ---- one-time weight layouts (wrapper side) ------------------------------
    def group_w(w, scale=1.0):           # (D, D) -> (NG, D, G*Dh) bf16
        w = (w * scale).astype(bf16)
        return jnp.transpose(w.reshape(D, NG, G * Dh), (1, 0, 2))

    def group_b(b, scale=1.0):           # (1, D) -> (NG, 1, G*Dh) f32
        return jnp.transpose((b * scale).reshape(1, NG, G * Dh), (1, 0, 2))

    wq_g = group_w(params["wq"], inv_scale)   # 1/sqrt(Dh) folded into q proj
    bq_g = group_b(params["bq"], inv_scale)
    wk_g = group_w(params["wk"]); bk_g = group_b(params["bk"])
    wv_g = group_w(params["wv"]); bv_g = group_b(params["bv"])
    wo_g = params["wo"].astype(bf16).reshape(NG, G * Dh, D)
    pos_bias_bf = pos_bias.astype(bf16)
    wf1_bf = params["wf1"].astype(bf16)
    wf2_bf = params["wf2"].astype(bf16)

    cparams = pltpu.CompilerParams(
        dimension_semantics=("parallel", "arbitrary"),
        vmem_limit_bytes=_vmem_limit_bytes(),
    )

    def const(shape):
        return pl.BlockSpec(shape, lambda b, i: (0,) * len(shape))

    def per_b(shape):
        return pl.BlockSpec(shape, lambda b, i: (b,) + (0,) * (len(shape) - 1))

    def per_i(shape):
        return pl.BlockSpec(shape, lambda b, i: (i,) + (0,) * (len(shape) - 1))

    # ---- call 1: LN1 + gated sparse attention + residual ---------------------
    attn_fn = functools.partial(
        attention_kernel, heads_per_group=G, head_dim=Dh,
        window_size=window_size, tau=tau)

    x1 = pl.pallas_call(
        attn_fn,
        out_shape=jax.ShapeDtypeStruct((B, L, D), jnp.float32),
        grid_spec=pltpu.PrefetchScalarGridSpec(
            num_scalar_prefetch=0,
            grid=(B, NG),
            in_specs=[
                per_b((1, L, D)),                               # x
                const((L, L)),                                  # pos_bias (bf16)
                const((1, D)), const((1, D)),                   # ln1 gamma/beta
                per_i((1, D, G * Dh)), per_i((1, 1, G * Dh)),   # wq, bq (group)
                per_i((1, D, G * Dh)), per_i((1, 1, G * Dh)),   # wk, bk (group)
                per_i((1, D, G * Dh)), per_i((1, 1, G * Dh)),   # wv, bv (group)
                per_i((1, G * Dh, D)), const((1, D)),           # wo (group), bo
            ],
            out_specs=per_b((1, L, D)),
            scratch_shapes=[pltpu.VMEM((L, D), jnp.bfloat16),   # LN1(x) cache
                            pltpu.VMEM((L, D), jnp.float32)],   # attn+proj acc
        ),
        compiler_params=cparams,
    )(x, pos_bias_bf, params["g1"], params["b1"],
      wq_g, bq_g, wk_g, bk_g, wv_g, bv_g, wo_g, params["bo"])

    # ---- call 2: LN2 + FFN (F-tiled) + residual -------------------------------
    out = pl.pallas_call(
        ffn_kernel,
        out_shape=jax.ShapeDtypeStruct((B, L, D), x.dtype),
        grid_spec=pltpu.PrefetchScalarGridSpec(
            num_scalar_prefetch=0,
            grid=(B, NF),
            in_specs=[
                per_b((1, L, D)),                                # x1
                const((1, D)), const((1, D)),                    # ln2 gamma/beta
                pl.BlockSpec((D, TF), lambda b, f: (0, f)),      # wf1 tile
                pl.BlockSpec((1, TF), lambda b, f: (0, f)),      # bf1 tile
                pl.BlockSpec((TF, D), lambda b, f: (f, 0)),      # wf2 tile
                const((1, D)),                                   # bf2
            ],
            out_specs=per_b((1, L, D)),
            scratch_shapes=[pltpu.VMEM((L, D), jnp.bfloat16),    # LN2(x1) cache
                            pltpu.VMEM((L, D), jnp.float32)],    # FFN accumulator
        ),
        compiler_params=cparams,
    )(x1, params["g2"], params["b2"], wf1_bf, params["bf1"], wf2_bf, params["bf2"])

    return out


# -----------------------------------------------------------------------------
# Pure-JAX reference (mirrors the PyTorch forward in eval mode, with matmul
# operands cast to bf16 at the same points as the kernel so the hard s>tau
# gate makes identical decisions).
# -----------------------------------------------------------------------------
def reference_block(x, pos_bias, params, *, num_heads, window_size, tau):
    B, L, D = x.shape
    H = num_heads
    Dh = D // H
    inv_scale = 1.0 / math.sqrt(Dh)
    f32, bf16 = jnp.float32, jnp.bfloat16

    def layernorm(t, g, b):
        mu = jnp.mean(t, axis=-1, keepdims=True)
        var = jnp.mean((t - mu) ** 2, axis=-1, keepdims=True)
        return (t - mu) * jax.lax.rsqrt(var + EPS) * g + b

    xn = layernorm(x, params["g1"], params["b1"]).astype(bf16)

    def proj(w, b, scale=1.0):
        return (jnp.einsum("bld,de->ble", xn, (w * scale).astype(bf16),
                           preferred_element_type=f32) + b * scale)

    q = proj(params["wq"], params["bq"], inv_scale)
    k = proj(params["wk"], params["bk"])
    v = proj(params["wv"], params["bv"])

    def heads(t):
        return t.reshape(B, L, H, Dh).transpose(0, 2, 1, 3).astype(bf16)

    qh, kh, vh = heads(q), heads(k), heads(v)
    s = jnp.einsum("bhld,bhmd->bhlm", qh, kh, preferred_element_type=f32)

    idx = jnp.arange(L)
    allowed = ((jnp.abs(idx[None, :] - idx[:, None]) <= window_size)
               | (idx[:, None] == 0) | (idx[None, :] == 0))[None, None]
    neg = jnp.finfo(f32).min
    s = jnp.where(allowed & (s > tau), s, neg)
    s = s + pos_bias.astype(bf16).astype(f32)[None, None]
    s = s - jnp.max(s, axis=-1, keepdims=True)
    p = jnp.exp(s)
    attn = p / jnp.sum(p, axis=-1, keepdims=True)

    pv = jnp.einsum("bhlm,bhmd->bhld", attn.astype(bf16), vh,
                    preferred_element_type=f32)
    pv = pv.transpose(0, 2, 1, 3).reshape(B, L, D).astype(bf16)
    attn_out = jnp.einsum("blk,kd->bld", pv, params["wo"].astype(bf16),
                          preferred_element_type=f32) + params["bo"]
    x1 = x + attn_out

    xn2 = layernorm(x1, params["g2"], params["b2"]).astype(bf16)
    h1 = jnp.maximum(jnp.einsum("bld,df->blf", xn2, params["wf1"].astype(bf16),
                                preferred_element_type=f32) + params["bf1"], 0.0)
    ffn = jnp.einsum("blf,fd->bld", h1.astype(bf16), params["wf2"].astype(bf16),
                     preferred_element_type=f32) + params["bf2"]
    return x1 + ffn


if __name__ == "__main__":
    B, L, D, H, F = 2, 8, 32, 4, 64
    window_size, tau = 2, 0.0

    key = jax.random.PRNGKey(0)
    keys = jax.random.split(key, 16)

    def lin(kk, fan_in, fan_out):
        return jax.random.normal(kk, (fan_in, fan_out), jnp.float32) * (1.0 / math.sqrt(fan_in))

    params = {
        "g1": jnp.ones((1, D), jnp.float32),
        "b1": jnp.zeros((1, D), jnp.float32),
        "wq": lin(keys[0], D, D), "bq": jax.random.normal(keys[1], (1, D)) * 0.02,
        "wk": lin(keys[2], D, D), "bk": jax.random.normal(keys[3], (1, D)) * 0.02,
        "wv": lin(keys[4], D, D), "bv": jax.random.normal(keys[5], (1, D)) * 0.02,
        "wo": lin(keys[6], D, D), "bo": jax.random.normal(keys[7], (1, D)) * 0.02,
        "g2": jnp.ones((1, D), jnp.float32),
        "b2": jnp.zeros((1, D), jnp.float32),
        "wf1": lin(keys[8], D, F), "bf1": jax.random.normal(keys[9], (1, F)) * 0.02,
        "wf2": lin(keys[10], F, D), "bf2": jax.random.normal(keys[11], (1, D)) * 0.02,
    }
    params = {k: v.astype(jnp.float32) for k, v in params.items()}

    x = jax.random.normal(keys[12], (B, L, D), jnp.float32)
    pos_bias = jax.random.normal(keys[13], (L, L), jnp.float32) * 0.1

    out = transformer_encoder_block(
        x, pos_bias, params, num_heads=H, window_size=window_size, tau=tau)
    out = jax.block_until_ready(out)

    ref = reference_block(
        x, pos_bias, params, num_heads=H, window_size=window_size, tau=tau)

    assert out.shape == (B, L, D)
    assert bool(jnp.all(jnp.isfinite(out)))
    # Tolerance covers the EUP approximate reciprocal in softmax and
    # bf16-operand / f32-accumulation order differences (reference mirrors the
    # kernel's bf16 MXU operand casts so the hard s>tau gate matches exactly).
    max_err = float(jnp.max(jnp.abs(out - ref)))
    assert jnp.allclose(out, ref, rtol=2e-2, atol=2e-2), max_err

    print("KERNEL_OK")
</pallas_src>

<mosaic_0001>
module attributes {stable_mosaic.version = 11 : i64} {
  func.func @attention_kernel(%arg0: i32, %arg1: i32, %arg2: memref<1x8x32xf32, #tpu.memory_space<vmem>>, %arg3: memref<8x8xbf16, #tpu.memory_space<vmem>>, %arg4: memref<1x32xf32, #tpu.memory_space<vmem>>, %arg5: memref<1x32xf32, #tpu.memory_space<vmem>>, %arg6: memref<1x32x32xbf16, #tpu.memory_space<vmem>>, %arg7: memref<1x1x32xf32, #tpu.memory_space<vmem>>, %arg8: memref<1x32x32xbf16, #tpu.memory_space<vmem>>, %arg9: memref<1x1x32xf32, #tpu.memory_space<vmem>>, %arg10: memref<1x32x32xbf16, #tpu.memory_space<vmem>>, %arg11: memref<1x1x32xf32, #tpu.memory_space<vmem>>, %arg12: memref<1x32x32xbf16, #tpu.memory_space<vmem>>, %arg13: memref<1x32xf32, #tpu.memory_space<vmem>>, %arg14: memref<1x8x32xf32, #tpu.memory_space<vmem>>, %arg15: memref<8x32xbf16, #tpu.memory_space<vmem>>, %arg16: memref<8x32xf32, #tpu.memory_space<vmem>>) attributes {dimension_semantics = [#tpu.dimension_semantics<parallel>, #tpu.dimension_semantics<arbitrary>], iteration_bounds = array<i64: 2, 1>, scalar_prefetch = 0 : i64, scratch_operands = 2 : i64, tpu.core_type = #tpu.core_type<tc>, window_params = [{transform_indices = @transform_0, window_bounds = array<i64: 1, 8, 32>}, {pipeline_mode = #tpu.pipeline_mode<synchronous>, transform_indices = @transform_1, window_bounds = array<i64: 8, 8>}, {pipeline_mode = #tpu.pipeline_mode<synchronous>, transform_indices = @transform_2, window_bounds = array<i64: 1, 32>}, {pipeline_mode = #tpu.pipeline_mode<synchronous>, transform_indices = @transform_3, window_bounds = array<i64: 1, 32>}, {transform_indices = @transform_4, window_bounds = array<i64: 1, 32, 32>}, {transform_indices = @transform_5, window_bounds = array<i64: 1, 1, 32>}, {transform_indices = @transform_6, window_bounds = array<i64: 1, 32, 32>}, {transform_indices = @transform_7, window_bounds = array<i64: 1, 1, 32>}, {transform_indices = @transform_8, window_bounds = array<i64: 1, 32, 32>}, {transform_indices = @transform_9, window_bounds = array<i64: 1, 1, 32>}, {transform_indices = @transform_10, window_bounds = array<i64: 1, 32, 32>}, {pipeline_mode = #tpu.pipeline_mode<synchronous>, transform_indices = @transform_11, window_bounds = array<i64: 1, 32>}, {transform_indices = @transform_12, window_bounds = array<i64: 1, 8, 32>}]} {
    %c0_i32 = arith.constant 0 : i32
    %0 = arith.cmpi eq, %arg1, %c0_i32 : i32
    %1 = arith.extui %0 : i1 to i32
    %c0_i32_0 = arith.constant 0 : i32
    %2 = arith.cmpi ne, %1, %c0_i32_0 : i32
    scf.if %2 {
      %c0_60 = arith.constant 0 : index
      %c0_61 = arith.constant 0 : index
      %c0_62 = arith.constant 0 : index
      %150 = vector.load %arg2[%c0_60, %c0_61, %c0_62] : memref<1x8x32xf32, #tpu.memory_space<vmem>>, vector<1x8x32xf32>
      %151 = vector.shape_cast %150 : vector<1x8x32xf32> to vector<8x32xf32>
      %cst_63 = arith.constant dense<0.000000e+00> : vector<8xf32>
      %152 = vector.multi_reduction <add>, %151, %cst_63 [1] : vector<8x32xf32> to vector<8xf32>
      %153 = vector.shape_cast %152 : vector<8xf32> to vector<8x1xf32>
      %cst_64 = arith.constant 3.200000e+01 : f32
      %154 = vector.broadcast %cst_64 : f32 to vector<8x1xf32>
      %155 = arith.divf %153, %154 : vector<8x1xf32>
      %156 = vector.broadcast %155 : vector<8x1xf32> to vector<8x32xf32>
      %157 = arith.subf %151, %156 : vector<8x32xf32>
      %158 = arith.mulf %157, %157 : vector<8x32xf32>
      %cst_65 = arith.constant dense<0.000000e+00> : vector<8xf32>
      %159 = vector.multi_reduction <add>, %158, %cst_65 [1] : vector<8x32xf32> to vector<8xf32>
      %160 = vector.shape_cast %159 : vector<8xf32> to vector<8x1xf32>
      %cst_66 = arith.constant 3.200000e+01 : f32
      %161 = vector.broadcast %cst_66 : f32 to vector<8x1xf32>
      %162 = arith.divf %160, %161 : vector<8x1xf32>
      %163 = vector.broadcast %155 : vector<8x1xf32> to vector<8x32xf32>
      %164 = arith.subf %151, %163 : vector<8x32xf32>
      %cst_67 = arith.constant 9.99999974E-6 : f32
      %165 = vector.broadcast %cst_67 : f32 to vector<8x1xf32>
      %166 = arith.addf %162, %165 : vector<8x1xf32>
      %167 = math.rsqrt %166 : vector<8x1xf32>
      %168 = vector.broadcast %167 : vector<8x1xf32> to vector<8x32xf32>
      %169 = arith.mulf %164, %168 : vector<8x32xf32>
      %c0_68 = arith.constant 0 : index
      %c0_69 = arith.constant 0 : index
      %170 = vector.load %arg4[%c0_68, %c0_69] : memref<1x32xf32, #tpu.memory_space<vmem>>, vector<1x32xf32>
      %171 = vector.broadcast %170 : vector<1x32xf32> to vector<8x32xf32>
      %172 = arith.mulf %169, %171 : vector<8x32xf32>
      %c0_70 = arith.constant 0 : index
      %c0_71 = arith.constant 0 : index
      %173 = vector.load %arg5[%c0_70, %c0_71] : memref<1x32xf32, #tpu.memory_space<vmem>>, vector<1x32xf32>
      %174 = vector.broadcast %173 : vector<1x32xf32> to vector<8x32xf32>
      %175 = arith.addf %172, %174 : vector<8x32xf32>
      %176 = arith.truncf %175 : vector<8x32xf32> to vector<8x32xbf16>
      %c0_72 = arith.constant 0 : index
      %c0_73 = arith.constant 0 : index
      %177 = vector.load %arg15[%c0_72, %c0_73] : memref<8x32xbf16, #tpu.memory_space<vmem>>, vector<8x32xbf16>
      tpu.vector_store %arg15[%c0_72, %c0_73], %176 {strides = array<i32>} : memref<8x32xbf16, #tpu.memory_space<vmem>>, vector<8x32xbf16>,
      %cst_74 = arith.constant 0.000000e+00 : f32
      %178 = vector.broadcast %cst_74 : f32 to vector<8x32xf32>
      %c0_75 = arith.constant 0 : index
      %c0_76 = arith.constant 0 : index
      %179 = vector.load %arg16[%c0_75, %c0_76] : memref<8x32xf32, #tpu.memory_space<vmem>>, vector<8x32xf32>
      tpu.vector_store %arg16[%c0_75, %c0_76], %178 {strides = array<i32>} : memref<8x32xf32, #tpu.memory_space<vmem>>, vector<8x32xf32>,
    } else {
    }
    %c0 = arith.constant 0 : index
    %c0_1 = arith.constant 0 : index
    %3 = vector.load %arg15[%c0, %c0_1] : memref<8x32xbf16, #tpu.memory_space<vmem>>, vector<8x32xbf16>
    %c0_2 = arith.constant 0 : index
    %c0_3 = arith.constant 0 : index
    %c0_4 = arith.constant 0 : index
    %4 = vector.load %arg6[%c0_2, %c0_3, %c0_4] : memref<1x32x32xbf16, #tpu.memory_space<vmem>>, vector<1x32x32xbf16>
    %5 = vector.shape_cast %4 : vector<1x32x32xbf16> to vector<32x32xbf16>
    %cst = arith.constant dense<0.000000e+00> : vector<8x32xf32>
    %6 = tpu.matmul %3, %5, %cst {dimension_numbers = #tpu.dot_dimension_numbers<[1], [0], [0], [1], [0, 0, 1, 1], [], []>} : vector<8x32xbf16>, vector<32x32xbf16>, vector<8x32xf32> -> vector<8x32xf32>
    %c0_5 = arith.constant 0 : index
    %c0_6 = arith.constant 0 : index
    %c0_7 = arith.constant 0 : index
    %7 = vector.load %arg7[%c0_5, %c0_6, %c0_7] : memref<1x1x32xf32, #tpu.memory_space<vmem>>, vector<1x1x32xf32>
    %8 = vector.shape_cast %7 : vector<1x1x32xf32> to vector<1x32xf32>
    %9 = vector.broadcast %8 : vector<1x32xf32> to vector<8x32xf32>
    %10 = arith.addf %6, %9 : vector<8x32xf32>
    %c0_8 = arith.constant 0 : index
    %c0_9 = arith.constant 0 : index
    %c0_10 = arith.constant 0 : index
    %11 = vector.load %arg8[%c0_8, %c0_9, %c0_10] : memref<1x32x32xbf16, #tpu.memory_space<vmem>>, vector<1x32x32xbf16>
    %12 = vector.shape_cast %11 : vector<1x32x32xbf16> to vector<32x32xbf16>
    %cst_11 = arith.constant dense<0.000000e+00> : vector<8x32xf32>
    %13 = tpu.matmul %3, %12, %cst_11 {dimension_numbers = #tpu.dot_dimension_numbers<[1], [0], [0], [1], [0, 0, 1, 1], [], []>} : vector<8x32xbf16>, vector<32x32xbf16>, vector<8x32xf32> -> vector<8x32xf32>
    %c0_12 = arith.constant 0 : index
    %c0_13 = arith.constant 0 : index
    %c0_14 = arith.constant 0 : index
    %14 = vector.load %arg9[%c0_12, %c0_13, %c0_14] : memref<1x1x32xf32, #tpu.memory_space<vmem>>, vector<1x1x32xf32>
    %15 = vector.shape_cast %14 : vector<1x1x32xf32> to vector<1x32xf32>
    %16 = vector.broadcast %15 : vector<1x32xf32> to vector<8x32xf32>
    %17 = arith.addf %13, %16 : vector<8x32xf32>
    %c0_15 = arith.constant 0 : index
    %c0_16 = arith.constant 0 : index
    %c0_17 = arith.constant 0 : index
    %18 = vector.load %arg10[%c0_15, %c0_16, %c0_17] : memref<1x32x32xbf16, #tpu.memory_space<vmem>>, vector<1x32x32xbf16>
    %19 = vector.shape_cast %18 : vector<1x32x32xbf16> to vector<32x32xbf16>
    %cst_18 = arith.constant dense<0.000000e+00> : vector<8x32xf32>
    %20 = tpu.matmul %3, %19, %cst_18 {dimension_numbers = #tpu.dot_dimension_numbers<[1], [0], [0], [1], [0, 0, 1, 1], [], []>} : vector<8x32xbf16>, vector<32x32xbf16>, vector<8x32xf32> -> vector<8x32xf32>
    %c0_19 = arith.constant 0 : index
    %c0_20 = arith.constant 0 : index
    %c0_21 = arith.constant 0 : index
    %21 = vector.load %arg11[%c0_19, %c0_20, %c0_21] : memref<1x1x32xf32, #tpu.memory_space<vmem>>, vector<1x1x32xf32>
    %22 = vector.shape_cast %21 : vector<1x1x32xf32> to vector<1x32xf32>
    %23 = vector.broadcast %22 : vector<1x32xf32> to vector<8x32xf32>
    %24 = arith.addf %20, %23 : vector<8x32xf32>
    %25 = tpu.iota {dimensions = array<i32: 0>} : vector<8x8xi32>
    %26 = tpu.iota {dimensions = array<i32: 1>} : vector<8x8xi32>
    %27 = arith.subi %25, %26 : vector<8x8xi32>
    %28 = math.absi %27 : vector<8x8xi32>
    %c2_i32 = arith.constant 2 : i32
    %29 = vector.broadcast %c2_i32 : i32 to vector<8x8xi32>
    %30 = arith.cmpi sle, %28, %29 : vector<8x8xi32>
    %c0_i32_22 = arith.constant 0 : i32
    %31 = vector.broadcast %c0_i32_22 : i32 to vector<8x8xi32>
    %32 = arith.cmpi eq, %25, %31 : vector<8x8xi32>
    %33 = arith.ori %30, %32 : vector<8x8xi1>
    %c0_i32_23 = arith.constant 0 : i32
    %34 = vector.broadcast %c0_i32_23 : i32 to vector<8x8xi32>
    %35 = arith.cmpi eq, %26, %34 : vector<8x8xi32>
    %36 = arith.ori %33, %35 : vector<8x8xi1>
    %c0_24 = arith.constant 0 : index
    %c0_25 = arith.constant 0 : index
    %37 = vector.load %arg3[%c0_24, %c0_25] : memref<8x8xbf16, #tpu.memory_space<vmem>>, vector<8x8xbf16>
    %38 = arith.extf %37 : vector<8x8xbf16> to vector<8x8xf32>
    %39 = vector.extract_strided_slice %10 {offsets = [0, 0], sizes = [8, 8], strides = [1, 1]} : vector<8x32xf32> to vector<8x8xf32>
    %40 = arith.truncf %39 : vector<8x8xf32> to vector<8x8xbf16>
    %41 = vector.extract_strided_slice %17 {offsets = [0, 0], sizes = [8, 8], strides = [1, 1]} : vector<8x32xf32> to vector<8x8xf32>
    %42 = arith.truncf %41 : vector<8x8xf32> to vector<8x8xbf16>
    %43 = vector.extract_strided_slice %24 {offsets = [0, 0], sizes = [8, 8], strides = [1, 1]} : vector<8x32xf32> to vector<8x8xf32>
    %44 = arith.truncf %43 : vector<8x8xf32> to vector<8x8xbf16>
    %cst_26 = arith.constant dense<0.000000e+00> : vector<8x8xf32>
    %45 = tpu.matmul %40, %42, %cst_26 {dimension_numbers = #tpu.dot_dimension_numbers<[1], [1], [0], [0], [0, 0, 1, 0], [], []>} : vector<8x8xbf16>, vector<8x8xbf16>, vector<8x8xf32> -> vector<8x8xf32>
    %cst_27 = arith.constant 0.000000e+00 : f32
    %46 = vector.broadcast %cst_27 : f32 to vector<8x8xf32>
    %47 = arith.cmpf ogt, %45, %46 : vector<8x8xf32>
    %48 = arith.andi %36, %47 : vector<8x8xi1>
    %cst_28 = arith.constant -3.40282347E+38 : f32
    %49 = vector.broadcast %cst_28 : f32 to vector<8x8xf32>
    %50 = arith.select %48, %45, %49 : vector<8x8xi1>, vector<8x8xf32>
    %51 = arith.addf %50, %38 : vector<8x8xf32>
    %cst_29 = arith.constant dense<0xFF800000> : vector<8xf32>
    %52 = vector.multi_reduction <maximumf>, %51, %cst_29 [1] : vector<8x8xf32> to vector<8xf32>
    %53 = vector.shape_cast %52 : vector<8xf32> to vector<8x1xf32>
    %54 = vector.broadcast %53 : vector<8x1xf32> to vector<8x8xf32>
    %55 = arith.subf %51, %54 : vector<8x8xf32>
    %56 = math.exp %55 : vector<8x8xf32>
    %cst_30 = arith.constant dense<0.000000e+00> : vector<8xf32>
    %57 = vector.multi_reduction <add>, %56, %cst_30 [1] : vector<8x8xf32> to vector<8xf32>
    %58 = vector.shape_cast %57 : vector<8xf32> to vector<8x1xf32>
    %59 = tpu.reciprocal %58 {approx = true} : vector<8x1xf32> -> vector<8x1xf32>
    %60 = vector.broadcast %59 : vector<8x1xf32> to vector<8x8xf32>
    %61 = arith.mulf %56, %60 : vector<8x8xf32>
    %62 = arith.truncf %61 : vector<8x8xf32> to vector<8x8xbf16>
    %cst_31 = arith.constant dense<0.000000e+00> : vector<8x8xf32>
    %63 = tpu.matmul %62, %44, %cst_31 {dimension_numbers = #tpu.dot_dimension_numbers<[1], [0], [0], [1], [0, 0, 1, 1], [], []>} : vector<8x8xbf16>, vector<8x8xbf16>, vector<8x8xf32> -> vector<8x8xf32>
    %64 = vector.extract_strided_slice %10 {offsets = [0, 8], sizes = [8, 8], strides = [1, 1]} : vector<8x32xf32> to vector<8x8xf32>
    %65 = arith.truncf %64 : vector<8x8xf32> to vector<8x8xbf16>
    %66 = vector.extract_strided_slice %17 {offsets = [0, 8], sizes = [8, 8], strides = [1, 1]} : vector<8x32xf32> to vector<8x8xf32>
    %67 = arith.truncf %66 : vector<8x8xf32> to vector<8x8xbf16>
    %68 = vector.extract_strided_slice %24 {offsets = [0, 8], sizes = [8, 8], strides = [1, 1]} : vector<8x32xf32> to vector<8x8xf32>
    %69 = arith.truncf %68 : vector<8x8xf32> to vector<8x8xbf16>
    %cst_32 = arith.constant dense<0.000000e+00> : vector<8x8xf32>
    %70 = tpu.matmul %65, %67, %cst_32 {dimension_numbers = #tpu.dot_dimension_numbers<[1], [1], [0], [0], [0, 0, 1, 0], [], []>} : vector<8x8xbf16>, vector<8x8xbf16>, vector<8x8xf32> -> vector<8x8xf32>
    %cst_33 = arith.constant 0.000000e+00 : f32
    %71 = vector.broadcast %cst_33 : f32 to vector<8x8xf32>
    %72 = arith.cmpf ogt, %70, %71 : vector<8x8xf32>
    %73 = arith.andi %36, %72 : vector<8x8xi1>
    %cst_34 = arith.constant -3.40282347E+38 : f32
    %74 = vector.broadcast %cst_34 : f32 to vector<8x8xf32>
    %75 = arith.select %73, %70, %74 : vector<8x8xi1>, vector<8x8xf32>
    %76 = arith.addf %75, %38 : vector<8x8xf32>
    %cst_35 = arith.constant dense<0xFF800000> : vector<8xf32>
    %77 = vector.multi_reduction <maximumf>, %76, %cst_35 [1] : vector<8x8xf32> to vector<8xf32>
    %78 = vector.shape_cast %77 : vector<8xf32> to vector<8x1xf32>
    %79 = vector.broadcast %78 : vector<8x1xf32> to vector<8x8xf32>
    %80 = arith.subf %76, %79 : vector<8x8xf32>
    %81 = math.exp %80 : vector<8x8xf32>
    %cst_36 = arith.constant dense<0.000000e+00> : vector<8xf32>
    %82 = vector.multi_reduction <add>, %81, %cst_36 [1] : vector<8x8xf32> to vector<8xf32>
    %83 = vector.shape_cast %82 : vector<8xf32> to vector<8x1xf32>
    %84 = tpu.reciprocal %83 {approx = true} : vector<8x1xf32> -> vector<8x1xf32>
    %85 = vector.broadcast %84 : vector<8x1xf32> to vector<8x8xf32>
    %86 = arith.mulf %81, %85 : vector<8x8xf32>
    %87 = arith.truncf %86 : vector<8x8xf32> to vector<8x8xbf16>
    %cst_37 = arith.constant dense<0.000000e+00> : vector<8x8xf32>
    %88 = tpu.matmul %87, %69, %cst_37 {dimension_numbers = #tpu.dot_dimension_numbers<[1], [0], [0], [1], [0, 0, 1, 1], [], []>} : vector<8x8xbf16>, vector<8x8xbf16>, vector<8x8xf32> -> vector<8x8xf32>
    %89 = vector.extract_strided_slice %10 {offsets = [0, 16], sizes = [8, 8], strides = [1, 1]} : vector<8x32xf32> to vector<8x8xf32>
    %90 = arith.truncf %89 : vector<8x8xf32> to vector<8x8xbf16>
    %91 = vector.extract_strided_slice %17 {offsets = [0, 16], sizes = [8, 8], strides = [1, 1]} : vector<8x32xf32> to vector<8x8xf32>
    %92 = arith.truncf %91 : vector<8x8xf32> to vector<8x8xbf16>
    %93 = vector.extract_strided_slice %24 {offsets = [0, 16], sizes = [8, 8], strides = [1, 1]} : vector<8x32xf32> to vector<8x8xf32>
    %94 = arith.truncf %93 : vector<8x8xf32> to vector<8x8xbf16>
    %cst_38 = arith.constant dense<0.000000e+00> : vector<8x8xf32>
    %95 = tpu.matmul %90, %92, %cst_38 {dimension_numbers = #tpu.dot_dimension_numbers<[1], [1], [0], [0], [0, 0, 1, 0], [], []>} : vector<8x8xbf16>, vector<8x8xbf16>, vector<8x8xf32> -> vector<8x8xf32>
    %cst_39 = arith.constant 0.000000e+00 : f32
    %96 = vector.broadcast %cst_39 : f32 to vector<8x8xf32>
    %97 = arith.cmpf ogt, %95, %96 : vector<8x8xf32>
    %98 = arith.andi %36, %97 : vector<8x8xi1>
    %cst_40 = arith.constant -3.40282347E+38 : f32
    %99 = vector.broadcast %cst_40 : f32 to vector<8x8xf32>
    %100 = arith.select %98, %95, %99 : vector<8x8xi1>, vector<8x8xf32>
    %101 = arith.addf %100, %38 : vector<8x8xf32>
    %cst_41 = arith.constant dense<0xFF800000> : vector<8xf32>
    %102 = vector.multi_reduction <maximumf>, %101, %cst_41 [1] : vector<8x8xf32> to vector<8xf32>
    %103 = vector.shape_cast %102 : vector<8xf32> to vector<8x1xf32>
    %104 = vector.broadcast %103 : vector<8x1xf32> to vector<8x8xf32>
    %105 = arith.subf %101, %104 : vector<8x8xf32>
    %106 = math.exp %105 : vector<8x8xf32>
    %cst_42 = arith.constant dense<0.000000e+00> : vector<8xf32>
    %107 = vector.multi_reduction <add>, %106, %cst_42 [1] : vector<8x8xf32> to vector<8xf32>
    %108 = vector.shape_cast %107 : vector<8xf32> to vector<8x1xf32>
    %109 = tpu.reciprocal %108 {approx = true} : vector<8x1xf32> -> vector<8x1xf32>
    %110 = vector.broadcast %109 : vector<8x1xf32> to vector<8x8xf32>
    %111 = arith.mulf %106, %110 : vector<8x8xf32>
    %112 = arith.truncf %111 : vector<8x8xf32> to vector<8x8xbf16>
    %cst_43 = arith.constant dense<0.000000e+00> : vector<8x8xf32>
    %113 = tpu.matmul %112, %94, %cst_43 {dimension_numbers = #tpu.dot_dimension_numbers<[1], [0], [0], [1], [0, 0, 1, 1], [], []>} : vector<8x8xbf16>, vector<8x8xbf16>, vector<8x8xf32> -> vector<8x8xf32>
    %114 = vector.extract_strided_slice %10 {offsets = [0, 24], sizes = [8, 8], strides = [1, 1]} : vector<8x32xf32> to vector<8x8xf32>
    %115 = arith.truncf %114 : vector<8x8xf32> to vector<8x8xbf16>
    %116 = vector.extract_strided_slice %17 {offsets = [0, 24], sizes = [8, 8], strides = [1, 1]} : vector<8x32xf32> to vector<8x8xf32>
    %117 = arith.truncf %116 : vector<8x8xf32> to vector<8x8xbf16>
    %118 = vector.extract_strided_slice %24 {offsets = [0, 24], sizes = [8, 8], strides = [1, 1]} : vector<8x32xf32> to vector<8x8xf32>
    %119 = arith.truncf %118 : vector<8x8xf32> to vector<8x8xbf16>
    %cst_44 = arith.constant dense<0.000000e+00> : vector<8x8xf32>
    %120 = tpu.matmul %115, %117, %cst_44 {dimension_numbers = #tpu.dot_dimension_numbers<[1], [1], [0], [0], [0, 0, 1, 0], [], []>} : vector<8x8xbf16>, vector<8x8xbf16>, vector<8x8xf32> -> vector<8x8xf32>
    %cst_45 = arith.constant 0.000000e+00 : f32
    %121 = vector.broadcast %cst_45 : f32 to vector<8x8xf32>
    %122 = arith.cmpf ogt, %120, %121 : vector<8x8xf32>
    %123 = arith.andi %36, %122 : vector<8x8xi1>
    %cst_46 = arith.constant -3.40282347E+38 : f32
    %124 = vector.broadcast %cst_46 : f32 to vector<8x8xf32>
    %125 = arith.select %123, %120, %124 : vector<8x8xi1>, vector<8x8xf32>
    %126 = arith.addf %125, %38 : vector<8x8xf32>
    %cst_47 = arith.constant dense<0xFF800000> : vector<8xf32>
    %127 = vector.multi_reduction <maximumf>, %126, %cst_47 [1] : vector<8x8xf32> to vector<8xf32>
    %128 = vector.shape_cast %127 : vector<8xf32> to vector<8x1xf32>
    %129 = vector.broadcast %128 : vector<8x1xf32> to vector<8x8xf32>
    %130 = arith.subf %126, %129 : vector<8x8xf32>
    %131 = math.exp %130 : vector<8x8xf32>
    %cst_48 = arith.constant dense<0.000000e+00> : vector<8xf32>
    %132 = vector.multi_reduction <add>, %131, %cst_48 [1] : vector<8x8xf32> to vector<8xf32>
    %133 = vector.shape_cast %132 : vector<8xf32> to vector<8x1xf32>
    %134 = tpu.reciprocal %133 {approx = true} : vector<8x1xf32> -> vector<8x1xf32>
    %135 = vector.broadcast %134 : vector<8x1xf32> to vector<8x8xf32>
    %136 = arith.mulf %131, %135 : vector<8x8xf32>
    %137 = arith.truncf %136 : vector<8x8xf32> to vector<8x8xbf16>
    %cst_49 = arith.constant dense<0.000000e+00> : vector<8x8xf32>
    %138 = tpu.matmul %137, %119, %cst_49 {dimension_numbers = #tpu.dot_dimension_numbers<[1], [0], [0], [1], [0, 0, 1, 1], [], []>} : vector<8x8xbf16>, vector<8x8xbf16>, vector<8x8xf32> -> vector<8x8xf32>
    %139 = tpu.concatenate %63, %88, %113, %138 in 1 : vector<8x8xf32>, vector<8x8xf32>, vector<8x8xf32>, vector<8x8xf32> -> vector<8x32xf32>
    %c0_50 = arith.constant 0 : index
    %c0_51 = arith.constant 0 : index
    %140 = vector.load %arg16[%c0_50, %c0_51] : memref<8x32xf32, #tpu.memory_space<vmem>>, vector<8x32xf32>
    %141 = arith.truncf %139 : vector<8x32xf32> to vector<8x32xbf16>
    %c0_52 = arith.constant 0 : index
    %c0_53 = arith.constant 0 : index
    %c0_54 = arith.constant 0 : index
    %142 = vector.load %arg12[%c0_52, %c0_53, %c0_54] : memref<1x32x32xbf16, #tpu.memory_space<vmem>>, vector<1x32x32xbf16>
    %143 = vector.shape_cast %142 : vector<1x32x32xbf16> to vector<32x32xbf16>
    %cst_55 = arith.constant dense<0.000000e+00> : vector<8x32xf32>
    %144 = tpu.matmul %141, %143, %cst_55 {dimension_numbers = #tpu.dot_dimension_numbers<[1], [0], [0], [1], [0, 0, 1, 1], [], []>} : vector<8x32xbf16>, vector<32x32xbf16>, vector<8x32xf32> -> vector<8x32xf32>
    %145 = arith.addf %140, %144 : vector<8x32xf32>
    %c0_56 = arith.constant 0 : index
    %c0_57 = arith.constant 0 : index
    %146 = vector.load %arg16[%c0_56, %c0_57] : memref<8x32xf32, #tpu.memory_space<vmem>>, vector<8x32xf32>
    tpu.vector_store %arg16[%c0_56, %c0_57], %145 {strides = array<i32>} : memref<8x32xf32, #tpu.memory_space<vmem>>, vector<8x32xf32>,
    %c0_i32_58 = arith.constant 0 : i32
    %147 = arith.cmpi eq, %arg1, %c0_i32_58 : i32
    %148 = arith.extui %147 : i1 to i32
    %c0_i32_59 = arith.constant 0 : i32
    %149 = arith.cmpi ne, %148, %c0_i32_59 : i32
    scf.if %149 {
      %c0_60 = arith.constant 0 : index
      %c0_61 = arith.constant 0 : index
      %c0_62 = arith.constant 0 : index
      %150 = vector.load %arg2[%c0_60, %c0_61, %c0_62] : memref<1x8x32xf32, #tpu.memory_space<vmem>>, vector<1x8x32xf32>
      %151 = vector.shape_cast %150 : vector<1x8x32xf32> to vector<8x32xf32>
      %c0_63 = arith.constant 0 : index
      %c0_64 = arith.constant 0 : index
      %152 = vector.load %arg16[%c0_63, %c0_64] : memref<8x32xf32, #tpu.memory_space<vmem>>, vector<8x32xf32>
      %153 = arith.addf %151, %152 : vector<8x32xf32>
      %c0_65 = arith.constant 0 : index
      %c0_66 = arith.constant 0 : index
      %154 = vector.load %arg13[%c0_65, %c0_66] : memref<1x32xf32, #tpu.memory_space<vmem>>, vector<1x32xf32>
      %155 = vector.broadcast %154 : vector<1x32xf32> to vector<8x32xf32>
      %156 = arith.addf %153, %155 : vector<8x32xf32>
      %c0_67 = arith.constant 0 : index
      %c0_68 = arith.constant 0 : index
      %c0_69 = arith.constant 0 : index
      %157 = vector.load %arg14[%c0_67, %c0_68, %c0_69] : memref<1x8x32xf32, #tpu.memory_space<vmem>>, vector<1x8x32xf32>
      %158 = vector.shape_cast %157 : vector<1x8x32xf32> to vector<8x32xf32>
      %159 = vector.shape_cast %156 : vector<8x32xf32> to vector<1x8x32xf32>
      tpu.vector_store %arg14[%c0_67, %c0_68, %c0_69], %159 {strides = array<i32>} : memref<1x8x32xf32, #tpu.memory_space<vmem>>, vector<1x8x32xf32>,
    } else {
    }
    return
  }
  func.func @transform_0(%arg0: i32, %arg1: i32) -> (i32, i32, i32) {
    %c0_i32 = arith.constant 0 : i32
    %c0_i32_0 = arith.constant 0 : i32
    %c0_i32_1 = arith.constant 0 : i32
    return %arg0, %c0_i32, %c0_i32_0 : i32, i32, i32
  }
  func.func @transform_1(%arg0: i32, %arg1: i32) -> (i32, i32) {
    %c0_i32 = arith.constant 0 : i32
    %c0_i32_0 = arith.constant 0 : i32
    %c0_i32_1 = arith.constant 0 : i32
    return %c0_i32, %c0_i32_0 : i32, i32
  }
  func.func @transform_2(%arg0: i32, %arg1: i32) -> (i32, i32) {
    %c0_i32 = arith.constant 0 : i32
    %c0_i32_0 = arith.constant 0 : i32
    %c0_i32_1 = arith.constant 0 : i32
    return %c0_i32, %c0_i32_0 : i32, i32
  }
  func.func @transform_3(%arg0: i32, %arg1: i32) -> (i32, i32) {
    %c0_i32 = arith.constant 0 : i32
    %c0_i32_0 = arith.constant 0 : i32
    %c0_i32_1 = arith.constant 0 : i32
    return %c0_i32, %c0_i32_0 : i32, i32
  }
  func.func @transform_4(%arg0: i32, %arg1: i32) -> (i32, i32, i32) {
    %c0_i32 = arith.constant 0 : i32
    %c0_i32_0 = arith.constant 0 : i32
    %c0_i32_1 = arith.constant 0 : i32
    return %arg1, %c0_i32, %c0_i32_0 : i32, i32, i32
  }
  func.func @transform_5(%arg0: i32, %arg1: i32) -> (i32, i32, i32) {
    %c0_i32 = arith.constant 0 : i32
    %c0_i32_0 = arith.constant 0 : i32
    %c0_i32_1 = arith.constant 0 : i32
    return %arg1, %c0_i32, %c0_i32_0 : i32, i32, i32
  }
  func.func @transform_6(%arg0: i32, %arg1: i32) -> (i32, i32, i32) {
    %c0_i32 = arith.constant 0 : i32
    %c0_i32_0 = arith.constant 0 : i32
    %c0_i32_1 = arith.constant 0 : i32
    return %arg1, %c0_i32, %c0_i32_0 : i32, i32, i32
  }
  func.func @transform_7(%arg0: i32, %arg1: i32) -> (i32, i32, i32) {
    %c0_i32 = arith.constant 0 : i32
    %c0_i32_0 = arith.constant 0 : i32
    %c0_i32_1 = arith.constant 0 : i32
    return %arg1, %c0_i32, %c0_i32_0 : i32, i32, i32
  }
  func.func @transform_8(%arg0: i32, %arg1: i32) -> (i32, i32, i32) {
    %c0_i32 = arith.constant 0 : i32
    %c0_i32_0 = arith.constant 0 : i32
    %c0_i32_1 = arith.constant 0 : i32
    return %arg1, %c0_i32, %c0_i32_0 : i32, i32, i32
  }
  func.func @transform_9(%arg0: i32, %arg1: i32) -> (i32, i32, i32) {
    %c0_i32 = arith.constant 0 : i32
    %c0_i32_0 = arith.constant 0 : i32
    %c0_i32_1 = arith.constant 0 : i32
    return %arg1, %c0_i32, %c0_i32_0 : i32, i32, i32
  }
  func.func @transform_10(%arg0: i32, %arg1: i32) -> (i32, i32, i32) {
    %c0_i32 = arith.constant 0 : i32
    %c0_i32_0 = arith.constant 0 : i32
    %c0_i32_1 = arith.constant 0 : i32
    return %arg1, %c0_i32, %c0_i32_0 : i32, i32, i32
  }
  func.func @transform_11(%arg0: i32, %arg1: i32) -> (i32, i32) {
    %c0_i32 = arith.constant 0 : i32
    %c0_i32_0 = arith.constant 0 : i32
    %c0_i32_1 = arith.constant 0 : i32
    return %c0_i32, %c0_i32_0 : i32, i32
  }
  func.func @transform_12(%arg0: i32, %arg1: i32) -> (i32, i32, i32) {
    %c0_i32 = arith.constant 0 : i32
    %c0_i32_0 = arith.constant 0 : i32
    %c0_i32_1 = arith.constant 0 : i32
    return %arg0, %c0_i32, %c0_i32_0 : i32, i32, i32
  }
}

</mosaic_0001>

<bundles_post_ra>
// kernel: tpu_custom_call.1
= control target key start
LH: loop header
LB: loop body
LE: loop exit
PB: predicated region body
PF: predicated region fallthrough
CT: control target
= control target key end

     0   :  { %s2748_s0 = inlined_call_operand.hbm [shape: f32[2,8,32], index: 0, kind: input, shape index: {}]   ;;  %s2749_s1 = inlined_call_operand.hbm [shape: bf16[8,8], index: 1, kind: input, shape index: {}]   ;;  %s2750_s2 = inlined_call_operand.vmem [shape: f32[1,32], index: 2, kind: input, shape index: {}]   ;;  %s2751_s3 = inlined_call_operand.vmem [shape: f32[1,32], index: 3, kind: input, shape index: {}]   ;;  %s2752_s4 = inlined_call_operand.hbm [shape: bf16[1,32,32], index: 4, kind: input, shape index: {}]   ;;  %s2753_s5 = inlined_call_operand.hbm [shape: f32[1,1,32], index: 5, kind: input, shape index: {}]   ;;  %s2754_s6 = inlined_call_operand.vmem [shape: bf16[1,32,32], index: 6, kind: input, shape index: {}]   ;;  %s2755_s7 = inlined_call_operand.hbm [shape: f32[1,1,32], index: 7, kind: input, shape index: {}]   ;;  %s2756_s8 = inlined_call_operand.hbm [shape: bf16[1,32,32], index: 8, kind: input, shape index: {}]   ;;  %s2757_s9 = inlined_call_operand.hbm [shape: f32[1,1,32], index: 9, kind: input, shape index: {}]   ;;  %s2758_s10 = inlined_call_operand.vmem [shape: bf16[1,32,32], index: 10, kind: input, shape index: {}]   ;;  %s2759_s11 = inlined_call_operand.vmem [shape: f32[1,32], index: 11, kind: input, shape index: {}]   ;;  %s2760_s12 = inlined_call_operand.hbm [shape: f32[2,8,32], index: 12, kind: output, shape index: {}]  }
   0x1   :  { %2768 = sst [smem:[#allocation23_spill]] %s2749_s1 }
   0x2   :  { %2769 = sst [smem:[#allocation24_spill]] %s2750_s2 }
   0x3   :  { %2770 = sst [smem:[#allocation25_spill]] %s2751_s3 }
   0x4   :  { %2771 = sst [smem:[#allocation26_spill]] %s2753_s5 }
   0x5   :  { %2772 = sst [smem:[#allocation27_spill]] %s2758_s10 }
   0x6   :  { %2773 = sst [smem:[#allocation28_spill]] %s2759_s11 }
   0x7   :  { %2774 = sst [smem:[#allocation29_spill]] %s2760_s12 }
   0x8   :  { %17 = vsyncpa [#allocation5], 0 }
   0x9   :  { %19 = vsyncpa [#allocation5 + $0x1], 0 }
   0xa   :  { %20 = vsyncpa [#allocation8], 0 }
   0xb   :  { %21 = vsyncpa [#allocation11], 0 }
   0xc   :  { %22 = vsyncpa [#allocation14], 0 }
   0xd   :  { %23 = vsyncpa [#allocation6], 0 }
   0xe   :  { %25 = vsyncpa [#allocation6 + $0x1], 0  ;;  %s2287_s21 = smov 0   ;;  %s2289_s22 = smov 0  }
   0xf   :  { %s2291_s23 = smov 0   ;;  %s2293_s24 = smov 0  }
  0x10   :  { %s2295_s25 = smov 0   ;;  %s2297_s26 = smov 0  }
  0x11 LB: > { %2775 = sst [smem:[#allocation22_spill]] %s2194_s24  ;;  %s2761_s27 = sadd.s32 4294967295, %s2202_s26   ;;  %s2202_s26 = sphi %s2297_s26, %s31_s26   ;;  %s2198_s25 = sphi %s2295_s25, %s2806_s25   ;;  %s2194_s24 = sphi %s2293_s24, %s2805_s24   ;;  %s2190_s23 = sphi %s2291_s23, %s2804_s23   ;;  %s2186_s22 = sphi %s2289_s22, %s2803_s22   ;;  %s2182_s21 = sphi %s2287_s21, %s2802_s21  }
  0x12   : > { %p1591_p0 = scmp.ge.s32.totalorder %s2202_s26, 1  ;;  %p2321_p1 = scmp.eq.s32.totalorder %s2761_s27, 0 }
  0x13   : > { %p366_p2 = scmp.lt.s32.totalorder %s2202_s26, 3  ;;  %s2204_s30 = smov [#allocation7]  }
  0x14   : > { %s2776_s28 = scalar_select %p2321_p1, 1, 0 }
  0x15   : > { %p2326_p3 = pnand %p1591_p0, %p366_p2  ;;  %s379_s13 = sshll.u32 %s2204_s30, 4  ;;  %s380_s13 = int_to_ptr.vmem [resolvable:$true] %s379_s13 }
  0x16   : > { %s2205_s14 = smov [#allocation10]   ;;  %s2206_s17 = smov [#allocation13]  }
  0x17   : > { %s2777_s29 = scalar_select %p2326_p3, 1, 0 }
  0x18   : > { %p1779_p5 = pneg %p2326_p3  ;;  %s414_s15 = sshll.u32 %s2205_s14, 4  ;;  %s2339_s15 = int_to_ptr.vmem [resolvable:$true] %s414_s15 }
  0x19   : > { %s2341_s18 = sshll.u32 %s2206_s17, 4  ;;  %s2779_s1 = sld [smem:[#allocation23_spill]]  ;;  %s449_s18 = int_to_ptr.vmem [resolvable:$true] %s2341_s18 }
  0x1a   : > { %p2335_p6 = pnand %p1779_p5, %p2321_p1 }
  0x1c   : > { %p2351_p8 = pneg %p2335_p6 }
  0x1f   : > { %s1910_s30 = scalar_lea.hbm %s2779_s1, 64 }
  0x20   : > { %p1911_p7 = scmp.ne.s32.totalorder %s2779_s1, %s1910_s30  ;;  %p1917_p11 = scmp.lt.u32.totalorder %s1910_s30, %s2779_s1 }
  0x22   : > { %p1913_p9 = pnand %p2351_p8, %p1911_p7 }
  0x24   : > { %p1914_p10 = pneg %p1913_p9 }
  0x26   : > { %p1919_p12 = pnand %p1917_p11, %p1914_p10 }
  0x28   : > { %1922 = shalt.err (!%p1919_p12)
}
  0x29   : > { %s1923_s19 = scalar_lea.vmem %s380_s13, 64  ;;  %p1931_p5 = scmp.lt.s32.totalorder %s380_s13, %s380_s13 }
  0x2a   : > { %p1924_p13 = scmp.ne.s32.totalorder %s380_s13, %s1923_s19  ;;  %p1932_p4 = scmp.lt.s32.totalorder %s1923_s19, %s1923_s19 }
  0x2c   : > { %p1926_p0 = pnand %p1924_p13, %p2351_p8  ;;  %p1933_p3 = por %p1932_p4, %p1931_p5 }
  0x2e   : > { %p1927_p2 = pneg %p1926_p0 }
  0x30   : > { %p1934_p1 = pnand %p1933_p3, %p1927_p2 }
  0x32   : > { %1937 = shalt.err (!%p1934_p1)
}
  0x33   : > { %1782 = dma.hbm_to_vmem [thread:$0]  (!%p2335_p6), %s2779_s1, 64, %s380_s13, [#allocation8]  }
  0x34   : > { %s2781_s5 = sld [smem:[#allocation26_spill]] }
  0x3a   : > { %s1938_s30 = scalar_lea.hbm %s2781_s5, 16 }
  0x3b   : > { %p1939_p7 = scmp.ne.s32.totalorder %s2781_s5, %s1938_s30  ;;  %p1945_p1 = scmp.lt.u32.totalorder %s1938_s30, %s2781_s5 }
  0x3d   : > { %p1941_p9 = pnand %p1939_p7, %p2351_p8 }
  0x3f   : > { %p1942_p4 = pneg %p1941_p9 }
  0x41   : > { %p1947_p3 = pnand %p1945_p1, %p1942_p4 }
  0x43   : > { %1950 = shalt.err (!%p1947_p3)
}
  0x44   : > { %s1951_s13 = scalar_lea.vmem %s2339_s15, 16  ;;  %s1958_s24 = scalar_lea.vmem %s2339_s15, 32 }
  0x45   : > { %p1952_p10 = scmp.ne.s32.totalorder %s2339_s15, %s1951_s13  ;;  %p1959_p13 = scmp.lt.s32.totalorder %s2339_s15, %s2339_s15 }
  0x46   : > { %p1960_p0 = scmp.lt.s32.totalorder %s1958_s24, %s1951_s13 }
  0x47   : > { %p1954_p11 = pnand %p1952_p10, %p2351_p8 }
  0x48   : > { %p1961_p2 = por %p1960_p0, %p1959_p13 }
  0x49   : > { %p1955_p12 = pneg %p1954_p11 }
  0x4b   : > { %p1962_p5 = pnand %p1961_p2, %p1955_p12 }
  0x4d   : > { %1965 = shalt.err (!%p1962_p5)
}
  0x4e   : > { %1788 = dma.hbm_to_vmem [thread:$0]  (!%p2335_p6), %s2781_s5, 16, %s2339_s15, [#allocation11]  }
  0x4f   : > { %s1966_s20 = scalar_lea.hbm %s2756_s8, 256 }
  0x50   : > { %p1967_p7 = scmp.ne.s32.totalorder %s2756_s8, %s1966_s20  ;;  %p1973_p1 = scmp.lt.u32.totalorder %s1966_s20, %s2756_s8 }
  0x52   : > { %p1969_p9 = pnand %p1967_p7, %p2351_p8 }
  0x54   : > { %p1970_p4 = pneg %p1969_p9 }
  0x56   : > { %p1975_p3 = pnand %p1973_p1, %p1970_p4 }
  0x58   : > { %1978 = shalt.err (!%p1975_p3)
}
  0x59   : > { %s1979_s24 = scalar_lea.vmem %s449_s18, 256  ;;  %p1987_p13 = scmp.lt.s32.totalorder %s449_s18, %s449_s18 }
  0x5a   : > { %p1980_p10 = scmp.ne.s32.totalorder %s449_s18, %s1979_s24  ;;  %p1988_p0 = scmp.lt.s32.totalorder %s1979_s24, %s1979_s24 }
  0x5c   : > { %p1982_p11 = pnand %p1980_p10, %p2351_p8  ;;  %p1989_p2 = por %p1988_p0, %p1987_p13 }
  0x5e   : > { %p1983_p12 = pneg %p1982_p11 }
  0x60   : > { %p1990_p5 = pnand %p1989_p2, %p1983_p12 }
  0x62   : > { %1993 = shalt.err (!%p1990_p5)
}
  0x63   : > { %s2207_s15 = smov 64   ;;  %s2208_s10 = smov 4  }
  0x64   : > { %1794 = dma.hbm_to_vmem [thread:$0]  (!%p2335_p6), %s2756_s8, 256, %s449_s18, [#allocation14], %s2207_s15, %s2207_s15, %s2208_s10  }
  0x65   : > { %s2209_s11 = smov [#allocation9]   ;;  %s2210_s30 = smov [#allocation12]  }
  0x66   : > { %s398_s20 = sshll.u32 %s2209_s11, 4  ;;  %s435_s17 = sshll.u32 %s2210_s30, 4  ;;  %s399_s20 = int_to_ptr.vmem [resolvable:$true] %s398_s20  ;;  %s436_s17 = int_to_ptr.vmem [resolvable:$true] %s435_s17 }
  0x67   : > { %s1994_s24 = scalar_lea.hbm %s2752_s4, 256 }
  0x68   : > { %p1995_p7 = scmp.ne.s32.totalorder %s2752_s4, %s1994_s24  ;;  %p2001_p1 = scmp.lt.u32.totalorder %s1994_s24, %s2752_s4 }
  0x6a   : > { %p1997_p9 = pnand %p1995_p7, %p2351_p8 }
  0x6c   : > { %p1998_p4 = pneg %p1997_p9 }
  0x6e   : > { %p2003_p3 = pnand %p2001_p1, %p1998_p4 }
  0x70   : > { %2006 = shalt.err (!%p2003_p3)
}
  0x71   : > { %s2007_s18 = scalar_lea.vmem %s399_s20, 256  ;;  %p2015_p13 = scmp.lt.s32.totalorder %s399_s20, %s399_s20 }
  0x72   : > { %p2008_p10 = scmp.ne.s32.totalorder %s399_s20, %s2007_s18  ;;  %p2016_p0 = scmp.lt.s32.totalorder %s2007_s18, %s2007_s18 }
  0x74   : > { %p2010_p11 = pnand %p2008_p10, %p2351_p8  ;;  %p2017_p2 = por %p2016_p0, %p2015_p13 }
  0x76   : > { %p2011_p12 = pneg %p2010_p11 }
  0x78   : > { %p2018_p5 = pnand %p2017_p2, %p2011_p12 }
  0x7a   : > { %2021 = shalt.err (!%p2018_p5)
}
  0x7b   : > { %1785 = dma.hbm_to_vmem [thread:$0]  (!%p2335_p6), %s2752_s4, 256, %s399_s20, [#allocation8], %s2207_s15, %s2207_s15, %s2208_s10  }
  0x7c   : > { %s2022_s12 = scalar_lea.hbm %s2755_s7, 16 }
  0x7d   : > { %p2023_p7 = scmp.ne.s32.totalorder %s2755_s7, %s2022_s12  ;;  %p2029_p1 = scmp.lt.u32.totalorder %s2022_s12, %s2755_s7 }
  0x7f   : > { %p2025_p9 = pnand %p2023_p7, %p2351_p8 }
  0x81   : > { %p2026_p4 = pneg %p2025_p9 }
  0x83   : > { %p2031_p3 = pnand %p2029_p1, %p2026_p4 }
  0x85   : > { %2034 = shalt.err (!%p2031_p3)
}
  0x86   : > { %s2035_s13 = scalar_lea.vmem %s436_s17, 16  ;;  %s2042_s15 = scalar_lea.vmem %s436_s17, 32 }
  0x87   : > { %p2036_p10 = scmp.ne.s32.totalorder %s436_s17, %s2035_s13  ;;  %p2043_p13 = scmp.lt.s32.totalorder %s436_s17, %s436_s17 }
  0x88   : > { %p2044_p0 = scmp.lt.s32.totalorder %s2042_s15, %s2035_s13 }
  0x89   : > { %p2038_p11 = pnand %p2036_p10, %p2351_p8 }
  0x8a   : > { %p2045_p2 = por %p2044_p0, %p2043_p13 }
  0x8b   : > { %p2039_p12 = pneg %p2038_p11 }
  0x8d   : > { %p2046_p5 = pnand %p2045_p2, %p2039_p12 }
  0x8f   : > { %2049 = shalt.err (!%p2046_p5)
}
  0x90   : > { %1791 = dma.hbm_to_vmem [thread:$0]  (!%p2335_p6), %s2755_s7, 16, %s436_s17, [#allocation11]  }
  0x91   : > { %s2211_s24 = smov [#allocation15]   ;;  %s2050_s2 = scalar_lea.hbm %s2757_s9, 16 }
  0x92   : > { %s464_s18 = sshll.u32 %s2211_s24, 4  ;;  %p2051_p7 = scmp.ne.s32.totalorder %s2757_s9, %s2050_s2  ;;  %s465_s18 = int_to_ptr.vmem [resolvable:$true] %s464_s18 }
  0x93   : > { %p2057_p1 = scmp.lt.u32.totalorder %s2050_s2, %s2757_s9 }
  0x94   : > { %p2053_p9 = pnand %p2051_p7, %p2351_p8 }
  0x96   : > { %p2054_p4 = pneg %p2053_p9 }
  0x98   : > { %p2059_p3 = pnand %p2057_p1, %p2054_p4 }
  0x9a   : > { %2062 = shalt.err (!%p2059_p3)
}
  0x9b   : > { %s2063_s17 = scalar_lea.vmem %s465_s18, 16  ;;  %s2070_s30 = scalar_lea.vmem %s465_s18, 32 }
  0x9c   : > { %p2064_p10 = scmp.ne.s32.totalorder %s465_s18, %s2063_s17  ;;  %p2071_p13 = scmp.lt.s32.totalorder %s465_s18, %s465_s18 }
  0x9d   : > { %p2072_p0 = scmp.lt.s32.totalorder %s2070_s30, %s2063_s17 }
  0x9e   : > { %p2066_p11 = pnand %p2064_p10, %p2351_p8 }
  0x9f   : > { %p2073_p2 = por %p2072_p0, %p2071_p13 }
  0xa0   : > { %p2067_p12 = pneg %p2066_p11 }
  0xa2   : > { %p2074_p5 = pnand %p2073_p2, %p2067_p12 }
  0xa4   : > { %2077 = shalt.err (!%p2074_p5)
}
  0xa5   : > { %1797 = dma.hbm_to_vmem [thread:$0]  (!%p2335_p6), %s2757_s9, 16, %s465_s18, [#allocation14]  }
  0xa6   : > { %s1590_s14 = sadd.s32 4294967294, %s2202_s26   ;;  %s43_s15 = sadd.s32 1, %s2198_s25 }
  0xa7   : > { %p45_p8 = scmp.ge.s32.totalorder %s43_s15, 2  ;;  %s50_s16 = sadd.s32 1, %s2190_s23 }
  0xa8   : > { %p57_p7 = scmp.ne.s32.totalorder %s2190_s23, %s2186_s22  ;;  %p58_p9 = scmp.eq.s32.totalorder %s2202_s26, 0 }
  0xa9   : > { %s2808_s15 = smov (%p45_p8, %s43_s15), 0  ;;  %p63_p1 = scmp.ne.s32.totalorder %s2186_s22, %s2182_s21 }
  0xaa   : > { %p2472_p4 = por %p58_p9, %p57_p7  ;;  %s47_s20 = ssub.s32 %s2198_s25, %s2808_s15 }
  0xab   : > { %s2783_s24 = sadd.s32 4294967295, %s2202_s26   ;;  %p48_p3 = scmp.eq.s32.totalorder %s47_s20, 0 }
  0xac   : > { %p353_p6 = scmp.eq.s32.totalorder %s2783_s24, 1  ;;  %p2784_p10 = scmp.ne.s32.totalorder %s2776_s28, 0 }
  0xad   : > { %p359_p13 = scmp.eq.s32.totalorder %s1590_s14, 1  ;;  %p1812_p2 = scmp.lt.s32.totalorder %s2202_s26, 2 }
  0xae   : > { %p2484_p11 = por %p2784_p10, %p63_p1  ;;  %p2488_p12 = por %p353_p6, %p57_p7 }
  0xaf   : > { %s2493_s5 = scalar_select %p48_p3, %s2190_s23, %s50_s16  }
  0xb0   : > { %s2786_s1 = scalar_select %p2488_p12, 1, 0 }
  0xb1   : > { %p2495_p0 = por %p359_p13, %p63_p1  ;;  %s486_s3 = sand.u32 1, %s2190_s23  }
  0xb2   : > { %s1602_s12 = sshll.u32 %s2198_s25, 7  ;;  %s1601_s27 = sshll.u32 %s486_s3, 3 }
  0xb3   : > { %s2787_s2 = scalar_select %p2495_p0, 1, 0 }
  0xb4   : > { %s2505_s30 = scalar_lea.hbm %s2748_s0, %s1602_s12  ;;  %s490_s19 = scalar_lea.vmem [#allocation4], %s1601_s27 }
  0xb5   : > { %s497_s13 = sshll.u32 %s490_s19, 4  ;;  %p2509_p5 = pnand %p1812_p2, %p2472_p4  ;;  %s2513_s13 = int_to_ptr.vmem [resolvable:$true] %s497_s13 }
  0xb6   : > { %s487_s16 = scalar_lea.sflag [#allocation5], %s486_s3  ;;  %s2078_s20 = scalar_lea.hbm %s2505_s30, 128 }
  0xb7   : > { %p2079_p8 = scmp.ne.s32.totalorder %s2505_s30, %s2078_s20  ;;  %p2080_p7 = pneg %p2509_p5 }
  0xb8   : > { %s2083_s10 = scalar_lea.hbm %s2748_s0, 256  ;;  %p2084_p4 = scmp.lt.u32.totalorder %s2505_s30, %s2748_s0 }
  0xb9   : > { %p2081_p9 = pnand %p2080_p7, %p2079_p8  ;;  %p2085_p6 = scmp.lt.u32.totalorder %s2083_s10, %s2078_s20 }
  0xba   : > { %p2087_p10 = scmp.lt.u32.totalorder %s2078_s20, %s2505_s30 }
  0xbb   : > { %p2082_p1 = pneg %p2081_p9  ;;  %p2086_p3 = por %p2085_p6, %p2084_p4 }
  0xbd   : > { %p2088_p13 = por %p2087_p10, %p2086_p3 }
  0xbf   : > { %p2089_p2 = pnand %p2088_p13, %p2082_p1 }
  0xc1   : > { %2092 = shalt.err (!%p2089_p2)
}
  0xc2   : > { %s2093_s3 = scalar_lea.vmem %s2513_s13, 128  ;;  %s2212_s17 = smov [#allocation4]  }
  0xc3   : > { %p2094_p8 = scmp.ne.s32.totalorder %s2513_s13, %s2093_s3  ;;  %s2098_s19 = sshll.u32 %s2212_s17, 4  ;;  %s2099_s19 = int_to_ptr.vmem [resolvable:$false] %s2098_s19 }
  0xc4   : > { %s2100_s24 = scalar_lea.vmem %s2099_s19, 256  ;;  %p2101_p12 = scmp.lt.s32.totalorder %s2513_s13, %s2099_s19 }
  0xc5   : > { %p2096_p9 = pnand %p2094_p8, %p2080_p7  ;;  %p2102_p4 = scmp.lt.s32.totalorder %s2100_s24, %s2093_s3 }
  0xc7   : > { %p2097_p0 = pneg %p2096_p9  ;;  %p2103_p6 = por %p2102_p4, %p2101_p12 }
  0xc9   : > { %p2104_p3 = pnand %p2103_p6, %p2097_p0 }
  0xcb   : > { %2107 = shalt.err (!%p2104_p3)
}
  0xcc   : > { %1801 = dma.hbm_to_vmem [thread:$0]  (!%p2509_p5), %s2505_s30, 128, %s2513_s13, %s487_s16  }
  0xcd   : > { %p2789_p1 = scmp.ne.s32.totalorder %s2777_s29, 0 }
  0xce   : > { %s2543_s20 = sand.u32 (!%p2789_p1), 1, %s2186_s22  }
  0xcf   : > { %506 = sbr.rel (%p2789_p1) target bundleno = 2041 (0x7f9), region = 68  ;;  %s1604_s12 = sshll.u32 (!%p2789_p1), %s2543_s20, 3 }
  0xd0   : > { %s509_s10 = scalar_lea.sflag (!%p2789_p1), [#allocation5], %s2543_s20  ;;  %s512_s27 = scalar_lea.vmem (!%p2789_p1), [#allocation4], %s1604_s12 }
  0xd6   : > { %2161 = dma.done.wait (%p2484_p11), %s509_s10, 128  }
  0xd7   : > { %2163 = vsyncadd (%p2484_p11), %s509_s10, 4294967168  ;;  %p2790_p12 = scmp.ne.s32.totalorder %s2776_s28, 0 }
  0xd9   : > { %2165 = dma.done.wait (%p2790_p12), [#allocation8], 320  }
  0xda   : > { %2167 = vsyncadd (%p2790_p12), [#allocation8], 4294966976 }
  0xdb   : > { %2169 = dma.done.wait (%p2790_p12), [#allocation11], 32  }
  0xdc   : > { %2171 = vsyncadd (%p2790_p12), [#allocation11], 4294967264 }
  0xdd   : > { %2173 = dma.done.wait (%p2790_p12), [#allocation14], 272  }
  0xde   : > { %2175 = vsyncadd (%p2790_p12), [#allocation14], 4294967024  ;;  %vm603_vm0 = vcmask 261120   ;;  %v2565_v0 = vld [vmem:[%s512_s27] sm:$0xff]  ;;  %v1884_v7 = vld [vmem:[#allocation9] sm:$0xff]   ;;  %v2213_v9 = vmov 0.0   ;;  %v832_v57 = vlaneseq }
  0xdf   : > { %v604_v1 = vsel %vm603_vm0, %v2565_v0, 0.0  ;;  %v1885_v8 = vld [vmem:[%s2754_s6] sm:$0xff]   ;;  %1671 = vmatprep.subr.bf16.mxu0 %v2213_v9  ;;  %637 = vst.msk [vmem:[#allocation3] sm:$0xff] %vm603_vm0, %v2213_v9  ;;  %1679 = vmatprep.subr.bf16.mxu1 %v2213_v9  ;;  %v1886_v10 = vld [vmem:[#allocation9 + $0x8] sm:$0xff]   ;;  %vm2214_vm1 = vmmov 0   ;;  %s2791_s16 = sld [smem:[#allocation24_spill]] }
  0xe0   : > { %605 = vadd.xlane.f32.xlu0 %v604_v1  ;;  %1672 = vmatpush3.bf16.msra.mxu0 %v1884_v7  ;;  %v1887_v11 = vld [vmem:[%s2754_s6 + $0x8] sm:$0xff]   ;;  %s2792_s17 = sld [smem:[#allocation25_spill]]  ;;  %vm635_vm2 = vcmask 257024   ;;  %v1888_v22 = vld [vmem:[#allocation13] sm:$0xff]   ;;  %v1889_v24 = vld [vmem:[#allocation13 + $0x8] sm:$0xff]   ;;  %vm850_vm3 = vcmask 64512  }
  0xe1   : > { %1680 = vmatpush3.bf16.msra.mxu1 %v1885_v8  ;;  %1673 = vmatprep.subr.bf16.mxu0 %v2213_v9  ;;  %v1618_v25 = vld [vmem:[#allocation12] ss:$0 sm:$0xff]  ;;  %v1614_v26 = vld [vmem:[#allocation10] ss:$0 sm:$0xff]  ;;  %s2215_s19 = smov 112   ;;  %s2216_s24 = smov 120  }
  0xe2   : > { %1681 = vmatprep.subr.bf16.mxu1 %v2213_v9  ;;  %1675 = vmatprep.mubr.msk.bf16.mxu0 %vm2214_vm1, %v2213_v9  ;;  %v1622_v39 = vld [vmem:[#allocation15] ss:$0 sm:$0xff]  ;;  %vm916_vm4 = vcmask 1043456   ;;  %s2217_s10 = smov 104   ;;  %v833_v58 = vshrl.u32 %v832_v57, 7  ;;  %v835_v59 = vand.u32 127, %v832_v57 }
  0xe3   : > { %1683 = vmatprep.mubr.msk.bf16.mxu1 %vm2214_vm1, %v2213_v9  ;;  %v845_v63 = vld [vmem:[#allocation7] sm:$0xf]  ;;  %s2795_s18 = sld [smem:[#allocation27_spill]]  ;;  %s2218_s28 = smov 8  }
  0xe4   : > { %1674 = vmatpush3.bf16.msra.mxu0 %v1886_v10  ;;  %v836_v60 = vsub.s32 %v833_v58, %v835_v59  ;;  %vm841_vm6 = vcmp.eq.s32.totalorder %v833_v58, 0  ;;  %vm843_vm8 = vcmp.eq.s32.totalorder %v835_v59, 0  ;;  %s2219_s30 = smov 16   ;;  %s2796_s11 = sld [smem:[#allocation22_spill]] }
  0xe5   : > { %1682 = vmatpush3.bf16.msra.mxu1 %v1887_v11  ;;  %1687 = vmatprep.subr.bf16.mxu0 %v2213_v9  ;;  %v1612_v16 = vld [vmem:[%s2791_s16] ss:$0 sm:$0xff]  ;;  %s2220_s16 = smov 24   ;;  %s1401_s14 = scalar_lea.sflag [#allocation6], %s2543_s20 }
  0xe6   : > { %1695 = vmatprep.subr.bf16.mxu1 %v2213_v9  ;;  %v1613_v18 = vld [vmem:[%s2792_s17] ss:$0 sm:$0xff]  ;;  %v838_v61 = vsub.s32 0, %v836_v60  ;;  %p2799_p0 = scmp.ne.s32.totalorder %s2786_s1, 0 }
  0xe8   : > { %v1626_v62 = vmin.u32 %v838_v61, %v836_v60 }
  0xea   : > { %vm840_vm5 = vcmp.le.s32.totalorder %v1626_v62, 2 }
  0xeb   : > { %vm842_vm7 = vmor %vm840_vm5, %vm841_vm6 }
  0xec   : > { %vm2637_vm9 = vmor %vm842_vm7, %vm843_vm8 }
 0x16d   : > { %v606_v2 = vpop.xlane.xlu0 %605 }
 0x16e   : > { %v608_v3 = vmul.f32 0.03125, %v606_v2 }
 0x170   : > { %v609_v4 = vsub.f32 %v2565_v0, %v608_v3  ;;  %v846_v3 = vunpack.c.l.bf16 %v845_v63 }
 0x172   : > { %v610_v5 = vmul.f32 %v609_v4, %v609_v4 }
 0x174   : > { %v611_v6 = vsel %vm603_vm0, %v610_v5, 0.0 }
 0x175   : > { %612 = vadd.xlane.f32.xlu0 %v611_v6 }
 0x202   : > { %v613_v12 = vpop.xlane.xlu0 %612 }
 0x203   : > { %v614_v13 = vmul.f32 0.03125, %v613_v12 }
 0x205   : > { %v615_v14 = vadd.f32 1e-05, %v614_v13 }
 0x207   : > { %1892 = vrsqrt.f32 %v615_v14 }
 0x211   : > { %v1893_v15 = vpop.eup %1892 }
 0x212   : > { %v617_v17 = vmul.f32 %v1893_v15, %v609_v4 }
 0x214   : > { %v625_v19 = vmul.f32 %v1612_v16, %v617_v17 }
 0x216   : > { %v633_v20 = vadd.f32 %v1613_v18, %v625_v19 }
 0x218   : > { %v634_v21 = vpack.c.bf16 %v633_v20, %v633_v20 }
 0x21a   : > { %636 = vst.msk [vmem:[#allocation2] sm:$0xf] %vm635_vm2, %v634_v21 }
 0x221   : > { %v638_v23 = vld [vmem:[#allocation2] sm:$0xf] }
 0x222   : > { %1676 = vmatmul.mubr.msk.bf16.vlgmr.msra.gmra.mrb[0].mxu0 %vm603_vm0, %v638_v23  ;;  %1684 = vmatmul.mubr.msk.bf16.vlgmr.msra.gmra.mrb[0].mxu1 %vm603_vm0, %v638_v23 }
 0x223   : > { %1688 = vmatpush3.bf16.msra.mxu0 %v1888_v22  ;;  %1691 = vmatprep.mubr.msk.bf16.mxu0 %vm2214_vm1, %v2213_v9 }
 0x224   : > { %1689 = vmatprep.subr.bf16.mxu0 %v2213_v9  ;;  %1697 = vmatprep.mubr.msk.bf16.mxu1 %vm2214_vm1, %v2213_v9 }
 0x227   : > { %1690 = vmatpush3.bf16.msra.mxu0 %v1889_v24 }
 0x228   : > { %1701 = vmatprep.subr.bf16.mxu0 %v2213_v9 }
 0x22a   : > { %1692 = vmatmul.mubr.msk.bf16.vlgmr.msra.gmra.mrb[4].mxu0 %vm603_vm0, %v638_v23 }
 0x22b   : > { %1703 = vmatprep.mubr.msk.bf16.mxu0 %vm2214_vm1, %v2213_v9 }
 0x2f5   : > { %v700_v27 = vpop.f32.mrb[0].mxu0  ;;  %v763_v28 = vpop.f32.mrb[0].mxu1 }
 0x2f6   : > { %v764_v29 = vadd.f32 %v1618_v25, %v763_v28  ;;  %v1677_v30 = vpop.f32.mrb[1].mxu0  ;;  %v1685_v31 = vpop.f32.mrb[1].mxu1  ;;  %v701_v34 = vadd.f32 %v1614_v26, %v700_v27 }
 0x2f7   : > { %v703_v32 = vpop.f32.mrb[2].mxu0  ;;  %v766_v33 = vpop.f32.mrb[2].mxu1 }
 0x2f8   : > { %v848_v35 = vpack.c.bf16 %v764_v29, %v764_v29  ;;  %v1678_v36 = vpop.f32.mrb[3].mxu0  ;;  %v1686_v37 = vpop.f32.mrb[3].mxu1  ;;  %v847_v40 = vpack.c.bf16 %v701_v34, %v701_v34 }
 0x2fa   : > { %1079 = vrot.lane.b32.xlu0 %v848_v35, %s2215_s19  ;;  %964 = vrot.lane.b32.xlu1 %v848_v35, %s2216_s24  ;;  %v855_v38 = vsel %vm850_vm3, %v848_v35, 0 }
 0x2fb   : > { %1696 = vmatpush3.bf16.xpose.msra.mxu1 %v855_v38 }
 0x2fc   : > { %1707 = vmatprep.subr.bf16.mxu1 %v2213_v9 }
 0x2fd   : > { %v826_v41 = vpop.f32.mrb[4].mxu0 }
 0x2fe   : > { %v827_v42 = vadd.f32 %v1622_v39, %v826_v41  ;;  %961 = vrot.lane.b32.xlu1 %v847_v40, %s2216_s24  ;;  %v1693_v43 = vpop.f32.mrb[5].mxu0 }
 0x2ff   : > { %v829_v44 = vpop.f32.mrb[6].mxu0 }
 0x300   : > { %v2611_v45 = vpack.c.bf16 %v827_v42, %v827_v42  ;;  %v1694_v46 = vpop.f32.mrb[7].mxu0 }
 0x302   : > { %1077 = vrot.lane.b32.xlu1 %v847_v40, %s2215_s19  ;;  %1698 = vmatmul.mubr.msk.bf16.vlgmr.msra.gmra.mrb[4].mxu1 %vm850_vm3, %v847_v40  ;;  %v918_v47 = vsel %vm916_vm4, %v2611_v45, 0 }
 0x303   : > { %1702 = vmatpush3.bf16.msra.mxu0 %v918_v47  ;;  %1709 = vmatprep.mubr.msk.bf16.mxu1 %vm2214_vm1, %v2213_v9 }
 0x304   : > { %1713 = vmatprep.subr.bf16.mxu0 %v2213_v9 }
 0x306   : > { %1193 = vrot.lane.b32.xlu1 %v848_v35, %s2217_s10 }
 0x30a   : > { %1191 = vrot.lane.b32.xlu1 %v847_v40, %s2217_s10 }
 0x36c   : > { %v965_v48 = vpop.permute.xlu1 %964  ;;  %v1080_v51 = vpop.permute.xlu0 %1079 }
 0x36d   : > { %v970_v49 = vsel %vm850_vm3, %v965_v48, 0  ;;  %v1085_v53 = vsel %vm850_vm3, %v1080_v51, 0 }
 0x36e   : > { %1708 = vmatpush3.bf16.xpose.msra.mxu1 %v970_v49 }
 0x36f   : > { %1719 = vmatprep.subr.bf16.mxu1 %v2213_v9 }
 0x370   : > { %v962_v50 = vpop.permute.xlu1 %961 }
 0x374   : > { %v1078_v52 = vpop.permute.xlu1 %1077 }
 0x375   : > { %1710 = vmatmul.mubr.msk.bf16.vlgmr.msra.gmra.mrb[8].mxu1 %vm850_vm3, %v962_v50 }
 0x376   : > { %1720 = vmatpush3.bf16.xpose.msra.mxu1 %v1085_v53  ;;  %1721 = vmatprep.mubr.msk.bf16.mxu1 %vm2214_vm1, %v2213_v9 }
 0x377   : > { %1731 = vmatprep.subr.bf16.mxu1 %v2213_v9 }
 0x378   : > { %v1194_v54 = vpop.permute.xlu1 %1193 }
 0x379   : > { %v1199_v55 = vsel %vm850_vm3, %v1194_v54, 0 }
 0x37c   : > { %v1192_v56 = vpop.permute.xlu1 %1191 }
 0x37d   : > { %1722 = vmatmul.mubr.msk.bf16.vlgmr.msra.gmra.mrb[12].mxu1 %vm850_vm3, %v1078_v52 }
 0x37e   : > { %1732 = vmatpush3.bf16.xpose.msra.mxu1 %v1199_v55  ;;  %1733 = vmatprep.mubr.msk.bf16.mxu1 %vm2214_vm1, %v2213_v9 }
 0x37f   : > { %1743 = vmatprep.subr.bf16.mxu1 %v2213_v9 }
 0x385   : > { %1734 = vmatmul.mubr.msk.bf16.vlgmr.msra.gmra.mrb[16].mxu1 %vm850_vm3, %v1192_v56 }
 0x386   : > { %1747 = vmatprep.mubr.msk.bf16.mxu1 %vm2214_vm1, %v2213_v9 }
 0x3d5   : > { %v891_v2 = vpop.f32.mrb[4].mxu1 }
 0x3d6   : > { %vm897_vm10 = vcmp.gt.f32.partialorder %v891_v2, 0.0  ;;  %v1699_v4 = vpop.f32.mrb[5].mxu1 }
 0x3d7   : > { %vm898_vm11 = vmand %vm2637_vm9, %vm897_vm10  ;;  %v894_v5 = vpop.f32.mrb[6].mxu1 }
 0x3d8   : > { %v899_v6 = vsel %vm898_vm11, %v891_v2, -3.4028235e+38  ;;  %v1700_v7 = vpop.f32.mrb[7].mxu1 }
 0x3d9   : > { %v900_v8 = vadd.f32 %v899_v6, %v846_v3 }
 0x3db   : > { %v901_v10 = vsel %vm850_vm3, %v900_v8, -inf }
 0x3dc   : > { %902 = vmax.xlane.f32.xlu1 %v901_v10 }
 0x448   : > { %v1006_v11 = vpop.f32.mrb[8].mxu1 }
 0x449   : > { %vm1012_vm12 = vcmp.gt.f32.partialorder %v1006_v11, 0.0  ;;  %v1711_v12 = vpop.f32.mrb[9].mxu1 }
 0x44a   : > { %vm1013_vm13 = vmand %vm2637_vm9, %vm1012_vm12  ;;  %v1009_v13 = vpop.f32.mrb[10].mxu1 }
 0x44b   : > { %v1014_v14 = vsel %vm1013_vm13, %v1006_v11, -3.4028235e+38  ;;  %v1712_v15 = vpop.f32.mrb[11].mxu1 }
 0x44c   : > { %v1015_v16 = vadd.f32 %v1014_v14, %v846_v3 }
 0x44e   : > { %v1016_v17 = vsel %vm850_vm3, %v1015_v16, -inf }
 0x44f   : > { %1017 = vmax.xlane.f32.xlu0 %v1016_v17 }
 0x450   : > { %v1121_v18 = vpop.f32.mrb[12].mxu1 }
 0x451   : > { %vm1127_vm14 = vcmp.gt.f32.partialorder %v1121_v18, 0.0  ;;  %v1723_v19 = vpop.f32.mrb[13].mxu1 }
 0x452   : > { %vm1128_vm15 = vmand %vm2637_vm9, %vm1127_vm14  ;;  %v1124_v20 = vpop.f32.mrb[14].mxu1 }
 0x453   : > { %v1129_v21 = vsel %vm1128_vm15, %v1121_v18, -3.4028235e+38  ;;  %v1724_v22 = vpop.f32.mrb[15].mxu1 }
 0x454   : > { %v1130_v23 = vadd.f32 %v1129_v21, %v846_v3 }
 0x456   : > { %v1131_v24 = vsel %vm850_vm3, %v1130_v23, -inf }
 0x457   : > { %1132 = vmax.xlane.f32.xlu1 %v1131_v24 }
 0x458   : > { %v1235_v25 = vpop.f32.mrb[16].mxu1 }
 0x459   : > { %vm1241_vm2 = vcmp.gt.f32.partialorder %v1235_v25, 0.0  ;;  %v1735_v26 = vpop.f32.mrb[17].mxu1 }
 0x45a   : > { %vm1242_vm5 = vmand %vm2637_vm9, %vm1241_vm2  ;;  %v1238_v27 = vpop.f32.mrb[18].mxu1 }
 0x45b   : > { %v1243_v28 = vsel %vm1242_vm5, %v1235_v25, -3.4028235e+38  ;;  %v1736_v29 = vpop.f32.mrb[19].mxu1  ;;  %v1891_v25 = vld [vmem:[%s2795_s18 + $0x8] sm:$0xff]  }
 0x45c   : > { %v1244_v30 = vadd.f32 %v1243_v28, %v846_v3 }
 0x45e   : > { %v1245_v31 = vsel %vm850_vm3, %v1244_v30, -inf }
 0x45f   : > { %1246 = vmax.xlane.f32.xlu1 %v1245_v31 }
 0x469   : > { %v903_v32 = vpop.xlane.xlu1 %902 }
 0x46a   : > { %v904_v33 = vsub.f32 %v900_v8, %v903_v32 }
 0x46c   : > { %v905_v34 = vmul.f32 1.442695, %v904_v33 }
 0x46e   : > { %1894 = vpow2.f32 %v905_v34 }
 0x478   : > { %v1895_v35 = vpop.eup %1894 }
 0x479   : > { %v907_v36 = vsel %vm850_vm3, %v1895_v35, 0.0 }
 0x47a   : > { %908 = vadd.xlane.f32.xlu0 %v907_v36  ;;  %v1322_v36 = vld [vmem:[#allocation3] sm:$0xff] }
 0x4dc   : > { %v1018_v37 = vpop.xlane.xlu0 %1017 }
 0x4dd   : > { %v1019_v38 = vsub.f32 %v1015_v16, %v1018_v37  ;;  %v1890_v16 = vld [vmem:[%s2795_s18] sm:$0xff]  }
 0x4de   : > { %1744 = vmatpush3.bf16.msra.mxu1 %v1890_v16 }
 0x4df   : > { %v1020_v39 = vmul.f32 1.442695, %v1019_v38  ;;  %1745 = vmatprep.subr.bf16.mxu1 %v2213_v9 }
 0x4e1   : > { %1896 = vpow2.f32 %v1020_v39 }
 0x4e2   : > { %1746 = vmatpush3.bf16.msra.mxu1 %v1891_v25 }
 0x4e4   : > { %v1133_v40 = vpop.xlane.xlu1 %1132 }
 0x4e5   : > { %v1134_v41 = vsub.f32 %v1130_v23, %v1133_v40 }
 0x4e7   : > { %v1135_v42 = vmul.f32 1.442695, %v1134_v41 }
 0x4e9   : > { %1898 = vpow2.f32 %v1135_v42 }
 0x4eb   : > { %v1897_v43 = vpop.eup %1896 }
 0x4ec   : > { %v1022_v44 = vsel %vm850_vm3, %v1897_v43, 0.0  ;;  %v1247_v49 = vpop.xlane.xlu1 %1246 }
 0x4ed   : > { %1023 = vadd.xlane.f32.xlu1 %v1022_v44  ;;  %v1248_v50 = vsub.f32 %v1244_v30, %v1247_v49 }
 0x4ef   : > { %v1249_v51 = vmul.f32 1.442695, %v1248_v50 }
 0x4f3   : > { %v1899_v46 = vpop.eup %1898 }
 0x4f4   : > { %v1137_v47 = vsel %vm850_vm3, %v1899_v46, 0.0 }
 0x4f5   : > { %1138 = vadd.xlane.f32.xlu0 %v1137_v47 }
 0x4fe   : > { %1143 = vrot.lane.b32.xlu1 %v2611_v45, %s2215_s19  ;;  %s2797_s19 = sld [smem:[#allocation28_spill]] }
 0x507   : > { %v909_v48 = vpop.xlane.xlu0 %908 }
 0x508   : > { %1900 = vrcp.f32 %v909_v48 }
 0x509   : > { %1902 = vpow2.f32 %v1249_v51 }
 0x50b   : > { %1029 = vrot.lane.b32.xlu0 %v2611_v45, %s2216_s24  ;;  %s1640_s24 = sshll.u32 %s2796_s11, 7 }
 0x512   : > { %v1901_v52 = vpop.eup %1900 }
 0x513   : > { %v911_v53 = vmul.f32 %v1901_v52, %v1895_v35  ;;  %v1903_v55 = vpop.eup %1902 }
 0x514   : > { %v1251_v56 = vsel %vm850_vm3, %v1903_v55, 0.0 }
 0x515   : > { %v912_v54 = vpack.c.bf16 %v911_v53, %v911_v53 }
 0x517   : > { %1704 = vmatmul.mubr.msk.bf16.vlgmr.msra.gmra.mrb[8].mxu0 %vm850_vm3, %v912_v54 }
 0x518   : > { %1715 = vmatprep.mubr.msk.bf16.mxu0 %vm2214_vm1, %v2213_v9 }
 0x522   : > { %1252 = vadd.xlane.f32.xlu1 %v1251_v56 }
 0x533   : > { %1257 = vrot.lane.b32.xlu1 %v2611_v45, %s2217_s10  ;;  %s586_s10 = scalar_lea.vmem [#allocation16], %s1604_s12  ;;  %s2221_s12 = smov [#allocation16]  }
 0x534   : > { %s1414_s27 = sshll.u32 %s586_s10, 4  ;;  %s2112_s11 = sshll.u32 %s2221_s12, 4  ;;  %s2700_s27 = int_to_ptr.vmem [resolvable:$true] %s1414_s27  ;;  %s2113_s11 = int_to_ptr.vmem [resolvable:$false] %s2112_s11 }
 0x535   : > { %s2114_s3 = scalar_lea.vmem %s2113_s11, 256  ;;  %p2115_p10 = scmp.lt.s32.totalorder %s2700_s27, %s2113_s11 }
 0x57a   : > { %v1024_v57 = vpop.xlane.xlu1 %1023 }
 0x57b   : > { %1904 = vrcp.f32 %v1024_v57 }
 0x57e   : > { %v1144_v63 = vpop.permute.xlu1 %1143 }
 0x57f   : > { %v1149_v2 = vsel %vm916_vm4, %v1144_v63, 0 }
 0x582   : > { %v1139_v58 = vpop.xlane.xlu0 %1138 }
 0x583   : > { %1906 = vrcp.f32 %v1139_v58 }
 0x585   : > { %v1905_v59 = vpop.eup %1904 }
 0x586   : > { %v1026_v60 = vmul.f32 %v1905_v59, %v1897_v43  ;;  %v1030_v61 = vpop.permute.xlu0 %1029  ;;  %v1638_v43 = vld [vmem:[%s2797_s19] ss:$0 sm:$0xff] }
 0x587   : > { %v1035_v62 = vsel %vm916_vm4, %v1030_v61, 0 }
 0x588   : > { %1714 = vmatpush3.bf16.msra.mxu0 %v1035_v62  ;;  %v1027_v1 = vpack.c.bf16 %v1026_v60, %v1026_v60 }
 0x589   : > { %1725 = vmatprep.subr.bf16.mxu0 %v2213_v9 }
 0x58b   : > { %1716 = vmatmul.mubr.msk.bf16.vlgmr.msra.gmra.mrb[12].mxu0 %vm850_vm3, %v1027_v1 }
 0x58c   : > { %1726 = vmatpush3.bf16.msra.mxu0 %v1149_v2  ;;  %1727 = vmatprep.mubr.msk.bf16.mxu0 %vm2214_vm1, %v2213_v9 }
 0x58d   : > { %v1907_v45 = vpop.eup %1906  ;;  %1737 = vmatprep.subr.bf16.mxu0 %v2213_v9 }
 0x58e   : > { %v1141_v3 = vmul.f32 %v1907_v45, %v1899_v46 }
 0x590   : > { %v1142_v4 = vpack.c.bf16 %v1141_v3, %v1141_v3 }
 0x593   : > { %1728 = vmatmul.mubr.msk.bf16.vlgmr.msra.gmra.mrb[16].mxu0 %vm850_vm3, %v1142_v4 }
 0x594   : > { %1739 = vmatprep.mubr.msk.bf16.mxu0 %vm2214_vm1, %v2213_v9  ;;  %vm1318_vm1 = vcmask 130048  }
 0x5af   : > { %v1253_v5 = vpop.xlane.xlu1 %1252 }
 0x5b0   : > { %1908 = vrcp.f32 %v1253_v5 }
 0x5b3   : > { %v1258_v6 = vpop.permute.xlu1 %1257 }
 0x5b4   : > { %v1263_v7 = vsel %vm916_vm4, %v1258_v6, 0  ;;  %vm1320_vm4 = vcmask 195584  }
 0x5b5   : > { %1738 = vmatpush3.bf16.msra.mxu0 %v1263_v7 }
 0x5ba   : > { %v1909_v8 = vpop.eup %1908 }
 0x5bb   : > { %v1255_v10 = vmul.f32 %v1909_v8, %v1903_v55 }
 0x5bd   : > { %v1256_v11 = vpack.c.bf16 %v1255_v10, %v1255_v10 }
 0x5bf   : > { %1740 = vmatmul.mubr.msk.bf16.vlgmr.msra.gmra.mrb[20].mxu0 %vm850_vm3, %v1256_v11 }
 0x5ea   : > { %v954_v12 = vpop.f32.mrb[8].mxu0 }
 0x5eb   : > { %v1705_v13 = vpop.f32.mrb[9].mxu0 }
 0x5ec   : > { %v957_v14 = vpop.f32.mrb[10].mxu0 }
 0x5ed   : > { %v1706_v15 = vpop.f32.mrb[11].mxu0 }
 0x65e   : > { %v1071_v17 = vpop.f32.mrb[12].mxu0 }
 0x65f   : > { %1306 = vrot.lane.b32.xlu0 %v1071_v17, %s2218_s28  ;;  %v1717_v18 = vpop.f32.mrb[13].mxu0 }
 0x660   : > { %v1074_v19 = vpop.f32.mrb[14].mxu0 }
 0x661   : > { %v1718_v20 = vpop.f32.mrb[15].mxu0 }
 0x666   : > { %v1185_v21 = vpop.f32.mrb[16].mxu0 }
 0x667   : > { %1310 = vrot.lane.b32.xlu1 %v1185_v21, %s2219_s30  ;;  %v1729_v22 = vpop.f32.mrb[17].mxu0  ;;  %s2798_s30 = sld [smem:[#allocation29_spill]] }
 0x668   : > { %v1188_v23 = vpop.f32.mrb[18].mxu0 }
 0x669   : > { %v1730_v24 = vpop.f32.mrb[19].mxu0 }
 0x66d   : > { %s2698_s13 = scalar_lea.hbm %s2798_s30, %s1640_s24 }
 0x692   : > { %v1299_v26 = vpop.f32.mrb[20].mxu0 }
 0x693   : > { %1314 = vrot.lane.b32.xlu0 %v1299_v26, %s2220_s16  ;;  %v1741_v9 = vpop.f32.mrb[21].mxu0  ;;  %s2108_s16 = scalar_lea.vmem %s2700_s27, 128 }
 0x694   : > { %v1302_v27 = vpop.f32.mrb[22].mxu0  ;;  %p2109_p11 = scmp.ne.s32.totalorder %s2700_s27, %s2108_s16  ;;  %p2116_p13 = scmp.lt.s32.totalorder %s2114_s3, %s2108_s16 }
 0x695   : > { %v1742_v28 = vpop.f32.mrb[23].mxu0 }
 0x696   : > { %p2110_p5 = pnand %p2109_p11, %p2799_p0  ;;  %p2117_p2 = por %p2116_p13, %p2115_p10 }
 0x698   : > { %p2111_p7 = pneg %p2110_p5 }
 0x69a   : > { %p2118_p8 = pnand %p2117_p2, %p2111_p7 }
 0x6d1   : > { %v1307_v29 = vpop.permute.xlu0 %1306 }
 0x6d2   : > { %v1317_v31 = vsel %vm850_vm3, %v954_v12, %v1307_v29 }
 0x6d9   : > { %v1311_v30 = vpop.permute.xlu1 %1310 }
 0x6da   : > { %v1319_v32 = vsel %vm1318_vm1, %v1317_v31, %v1311_v30 }
 0x705   : > { %v1315_v33 = vpop.permute.xlu0 %1314 }
 0x706   : > { %v1321_v34 = vsel %vm1320_vm4, %v1319_v32, %v1315_v33 }
 0x707   : > { %v1323_v35 = vpack.c.bf16 %v1321_v34, %v1321_v34 }
 0x709   : > { %1748 = vmatmul.mubr.msk.bf16.vlgmr.msra.gmra.mrb[20].mxu1 %vm603_vm0, %v1323_v35 }
 0x7dc   : > { %v1377_v37 = vpop.f32.mrb[20].mxu1 }
 0x7dd   : > { %v1383_v38 = vadd.f32 %v1377_v37, %v1322_v36  ;;  %v1749_v39 = vpop.f32.mrb[21].mxu1 }
 0x7de   : > { %v1380_v40 = vpop.f32.mrb[22].mxu1 }
 0x7df   : > { %1384 = vst.msk [vmem:[#allocation3] sm:$0xff] %vm603_vm0, %v1383_v38  ;;  %v1750_v41 = vpop.f32.mrb[23].mxu1 }
 0x7e6   : > { %v1389_v42 = vld [vmem:[#allocation3] sm:$0xff] }
 0x7e7   : > { %v1390_v44 = vadd.f32 %v1389_v42, %v2565_v0 }
 0x7e9   : > { %v1398_v46 = vadd.f32 %v1638_v43, %v1390_v44 }
 0x7eb   : > { %1399 = vst.msk [vmem:[%s586_s10] sm:$0xff] %vm603_vm0, %v1398_v46 }
 0x7ec   : > { %2121 = shalt.err (!%p2118_p8)
}
 0x7ed   : > { %s2122_s20 = scalar_lea.hbm %s2698_s13, 128  ;;  %s2126_s24 = scalar_lea.hbm %s2798_s30, 256 }
 0x7ee   : > { %p2123_p9 = scmp.ne.s32.totalorder %s2698_s13, %s2122_s20  ;;  %p2127_p3 = scmp.lt.u32.totalorder %s2698_s13, %s2798_s30 }
 0x7ef   : > { %p2128_p1 = scmp.lt.u32.totalorder %s2126_s24, %s2122_s20  ;;  %p2130_p11 = scmp.lt.u32.totalorder %s2122_s20, %s2698_s13 }
 0x7f0   : > { %p2124_p4 = pnand %p2123_p9, %p2799_p0 }
 0x7f1   : > { %p2129_p12 = por %p2128_p1, %p2127_p3 }
 0x7f2   : > { %p2125_p6 = pneg %p2124_p4 }
 0x7f3   : > { %p2131_p5 = por %p2130_p11, %p2129_p12 }
 0x7f5   : > { %p2132_p7 = pnand %p2131_p5, %p2125_p6 }
 0x7f7   : > { %2135 = shalt.err (!%p2132_p7)
}
 0x7f8   : > { %1777 = dma.vmem_to_hbm [thread:$0]  (%p2799_p0), %s2700_s27, 128, %s2698_s13, %s1401_s14  }
 0x7f9 PF: > { %s1426_s28 = sand.u32 1, %s2182_s21   ;;  %p2800_p10 = scmp.ne.s32.totalorder %s2787_s2, 0 }
 0x7fa   : > { %p2801_p13 = scmp.ge.s32.totalorder %s2202_s26, 2  ;;  %s1427_s16 = scalar_lea.sflag [#allocation6], %s1426_s28 }
 0x7fc   : > { %p1803_p2 = pnand %p2801_p13, %p2800_p10 }
 0x7fe   : > { %2177 = dma.done.wait (!%p1803_p2), %s1427_s16, 128  }
 0x7ff   : > { %2179 = vsyncadd (!%p1803_p2), %s1427_s16, 4294967168  ;;  %s31_s26 = sadd.s32 1, %s2202_s26   ;;  %s2802_s21 = smov %s2186_s22 }
 0x800   : > { %p28_p8 = scmp.ge.s32.totalorder %s31_s26, 4   ;;  %s2803_s22 = smov %s2190_s23 }
 0x801   : > { %s2804_s23 = smov %s2493_s5  ;;  %s2805_s24 = smov %s2198_s25 }
 0x802   : > { %s2806_s25 = smov %s2808_s15  ;;  %30 = sbr.rel (!%p28_p8) target bundleno = 17 (0x11), region = 156 }
 0x809   :  { %1432 = vsyncpa [#allocation5], 1 }
 0x80a   :  { %1434 = vsyncpa [#allocation5 + $0x1], 1 }
 0x80b   :  { %1435 = vsyncpa [#allocation8], 1 }
 0x80c   :  { %1436 = vsyncpa [#allocation11], 1 }
 0x80d   :  { %1437 = vsyncpa [#allocation14], 1 }
 0x80e   :  { %1438 = vsyncpa [#allocation6], 1 }
 0x80f   :  { %1440 = vsyncpa [#allocation6 + $0x1], 1 }

</bundles_post_ra>
